<compile_context>
chip_gen: v7x
topology: tpu7x:2x2x1
jax: 0.10.0
libtpu: 0.0.40
codegen_flags: <defaults>
</compile_context>

<pallas_src>
import functools
import math

import jax
import jax.numpy as jnp
import numpy as np
from jax.experimental import pallas as pl
from jax.experimental.pallas import tpu as pltpu


def _round_up(x, m):
    return ((x + m - 1) // m) * m


def _pick_bn(n, vp, c_in, c_out, de, in_itemsize, out_itemsize,
             vmem_budget_bytes=12 * 1024 * 1024):
    """Pick the batch block BN.

    Targets: (a) >= 2 grid steps whenever N >= 2 so v7x can shard the 'parallel'
    axis across its 2 TensorCores, (b) BN*Vp in the 256-1024 range so the fused
    projection matmul has an MXU-friendly M and per-step overhead is amortized,
    (c) conservative VMEM footprint (double-buffered x/out blocks + live f32
    intermediates) so the same BN is safe on v7x's 64 MiB VMEM.
    """
    per_b = (2 * vp * c_in * in_itemsize                      # x block, double buffered
             + 2 * c_out * vp * out_itemsize                  # out block, double buffered
             + 4 * (vp * (c_out + de) + 2 * vp * vp + c_out * vp))  # f32 intermediates
    bn_vmem = max(1, vmem_budget_bytes // max(per_b, 1))
    bn_hi = max(1, 1024 // vp)          # keep BN*Vp <= 1024
    bn_lo = max(1, 256 // vp)           # keep BN*Vp >= 256 when N permits
    bn = min(bn_hi, bn_vmem, max(bn_lo, pl.cdiv(n, 8)))   # aim for ~8 steps at large N
    bn = min(bn, max(1, pl.cdiv(n, 2)))                    # >= 2 grid steps when N >= 2
    return max(1, bn)


def _st_gcn_kernel(x_ref, w_ref, b_ref, o_ref, *, v_valid, c_out, de):
    # x_ref : (BN, Vp, C_in)        node features (zero padded on the node axis)
    # w_ref : (C_in, C_out + De)    packed [Wc^T | We * De^-1/4]   (VMEM resident)
    # b_ref : (1,    C_out + De)    packed [bc   | be * De^-1/4]   (VMEM resident, f32)
    # o_ref : (BN, C_out, V)        final 'ncw' output block (no wrapper permute)
    f32 = jnp.float32
    x = x_ref[...]
    bn, vp, c_in = x.shape
    cdt = x.dtype                      # matmul input dtype (bf16 fast path / f32)

    # ---- fused projections: one (BN*Vp, C_in) x (C_in, C_out+De) matmul ----
    x2 = x.reshape(bn * vp, c_in)
    ey = jnp.dot(x2, w_ref[...], preferred_element_type=f32) + b_ref[...]
    y = ey[:, :c_out].reshape(bn, vp, c_out)                 # conv output (f32)
    e = ey[:, c_out:].reshape(bn, vp, de).astype(cdt)        # embeddings, cast for MXU

    # ---- LAL adjacency: scores = e e^T (1/sqrt(De) pre-folded into We/be) ----
    # trans_b form: MXU absorbs the transpose, accumulate in f32.
    scores = jax.lax.dot_general(e, e, (((2,), (2,)), ((0,), (0,))),
                                 preferred_element_type=f32)          # (BN, Vp, Vp)
    col_ids = jax.lax.broadcasted_iota(jnp.int32, (1, 1, vp), 2)
    row_ids = jax.lax.broadcasted_iota(jnp.int32, (1, vp, 1), 1)
    # mask padded key columns while scores are still f32
    scores = jnp.where(col_ids < v_valid, scores, -1e30)
    m = scores.max(axis=-1, keepdims=True)                    # XLU lane reduction
    p = jnp.exp(scores - m)                                   # EUP
    denom = p.sum(axis=-1, keepdims=True)
    a = p * pl.reciprocal(denom, approx=True)                 # EUP reciprocal (documented approx)
    a = jnp.where(row_ids < v_valid, a, 0.0)                  # zero padded query rows

    # ---- out[n,c,w] = sum_v y[n,v,c] * A[n,v,w]  -> (BN, C_out, Vp) directly ----
    # contraction over dim 1 of both operands: MXU absorbs the transpose, no vxpose.
    out = jax.lax.dot_general(y.astype(cdt), a.astype(cdt),
                              (((1,), (1,)), ((0,), (0,))),
                              preferred_element_type=f32)
    o_ref[...] = out[:, :, :v_valid].astype(o_ref.dtype)      # drop node padding in-kernel


def st_gcn_forward(x, conv_w, conv_b, lal_w, lal_b, *, bn=None,
                   compute_dtype=jnp.bfloat16, out_dtype=None):
    """Fused Pallas st_gcn forward.

    Args:
      x:       (N, V, C_in)  node features (layout st_gcn.forward consumes).
      conv_w:  (C_out, C_in) 1x1 Conv2d weight (kernel dims squeezed).
      conv_b:  (C_out,)      Conv2d bias.
      lal_w:   (C_in, De)    LAL embedding weight (see TODO above).
      lal_b:   (De,)         LAL embedding bias.
      compute_dtype: MXU input dtype (bf16 default; accumulation is always f32).
      out_dtype: output dtype (defaults to x.dtype; bf16 halves the dominant HBM write).
    Returns:
      (N, C_out, V) -- matching the PyTorch module's return value.
    """
    n, v, c_in = x.shape
    c_out = conv_w.shape[0]
    de = lal_w.shape[1]
    out_dtype = x.dtype if out_dtype is None else out_dtype

    # bf16 packs 2 rows per sublane -> align the node axis to 16 on 16-bit dtypes
    sub = 16 if jnp.dtype(compute_dtype).itemsize == 2 else 8
    vp = max(sub, _round_up(v, sub))

    if bn is None:
        bn = _pick_bn(n, vp, c_in, c_out, de,
                      jnp.dtype(compute_dtype).itemsize,
                      jnp.dtype(out_dtype).itemsize)
    bn = max(1, min(bn, n))
    n_pad = _round_up(n, bn)
    grid = (n_pad // bn,)

    # pad only what is needed (node axis + ragged batch tail); in-kernel masking
    # keeps the zero pad from leaking into valid outputs.
    xp = x.astype(compute_dtype)
    if vp != v or n_pad != n:
        xp = jnp.pad(xp, ((0, n_pad - n), (0, vp - v), (0, 0)))

    # fold 1/sqrt(De) into the embedding weight/bias (scores = e e^T then needs no scale)
    s = float(de) ** -0.25
    w_packed = jnp.concatenate([conv_w.T, lal_w * s], axis=1).astype(compute_dtype)   # (C_in, C_out+De)
    b_packed = jnp.concatenate([conv_b, lal_b * s]).reshape(1, c_out + de).astype(jnp.float32)

    kernel = functools.partial(_st_gcn_kernel, v_valid=v, c_out=c_out, de=de)
    resident = lambda i: (0, 0)                      # same block every step -> VMEM resident

    out = pl.pallas_call(
        kernel,
        out_shape=jax.ShapeDtypeStruct((n_pad, c_out, v), out_dtype),
        grid_spec=pltpu.PrefetchScalarGridSpec(
            num_scalar_prefetch=0,
            grid=grid,
            in_specs=[
                pl.BlockSpec((bn, vp, c_in), lambda i: (i, 0, 0)),      # x
                pl.BlockSpec((c_in, c_out + de), resident),             # [Wc^T | We]
                pl.BlockSpec((1, c_out + de), resident),                # [bc | be]
            ],
            out_specs=pl.BlockSpec((bn, c_out, v), lambda i: (i, 0, 0)),  # final 'ncw' layout
        ),
        compiler_params=pltpu.CompilerParams(
            dimension_semantics=("parallel",),       # shard batch blocks across TCs
            vmem_limit_bytes=32 * 1024 * 1024,       # footprint is tiny; safe on v7x's 64 MiB
        ),
    )(xp, w_packed, b_packed)

    return out if n_pad == n else out[:n]


def _reference(x, conv_w, conv_b, lal_w, lal_b):
    """Pure-JAX reference of the same forward pass."""
    e = x @ lal_w + lal_b                                   # (N, V, De)
    scores = jnp.einsum('nvd,nwd->nvw', e, e) / math.sqrt(e.shape[-1])
    a = jax.nn.softmax(scores, axis=-1)                     # (N, V, V)
    y = x @ conv_w.T + conv_b                               # (N, V, C_out) == 1x1 conv
    return jnp.einsum('nvc,nvw->ncw', y, a)                 # (N, C_out, V)


if __name__ == "__main__":
    key = jax.random.PRNGKey(0)
    n, v, c_in, c_out, de = 16, 25, 16, 128, 32
    kx, kw, kb, kwe, kbe = jax.random.split(key, 5)
    x = jax.random.normal(kx, (n, v, c_in), jnp.float32)
    conv_w = jax.random.normal(kw, (c_out, c_in), jnp.float32) / math.sqrt(c_in)
    conv_b = jax.random.normal(kb, (c_out,), jnp.float32) * 0.1
    lal_w = jax.random.normal(kwe, (c_in, de), jnp.float32) / math.sqrt(c_in)
    lal_b = jax.random.normal(kbe, (de,), jnp.float32) * 0.1

    ref = jax.block_until_ready(_reference(x, conv_w, conv_b, lal_w, lal_b))

    # f32 path: tight numeric check against the pure-JAX reference
    out_f32 = jax.block_until_ready(
        st_gcn_forward(x, conv_w, conv_b, lal_w, lal_b, compute_dtype=jnp.float32))
    np.testing.assert_allclose(np.asarray(out_f32), np.asarray(ref),
                               rtol=2e-2, atol=2e-2)

    # default path: bf16 MXU inputs, f32 accumulation, f32 output (looser check)
    out_def = jax.block_until_ready(
        st_gcn_forward(x, conv_w, conv_b, lal_w, lal_b))
    np.testing.assert_allclose(np.asarray(out_def), np.asarray(ref),
                               rtol=1e-1, atol=1e-1)

    # bf16 output path (halves the dominant HBM write when the caller tolerates it)
    out_bf16 = jax.block_until_ready(
        st_gcn_forward(x, conv_w, conv_b, lal_w, lal_b, out_dtype=jnp.bfloat16))

    assert out_f32.shape == (n, c_out, v)
    assert out_def.shape == (n, c_out, v)
    assert out_bf16.shape == (n, c_out, v) and out_bf16.dtype == jnp.bfloat16
    print("KERNEL_OK")
</pallas_src>

<mosaic_0001>
module attributes {stable_mosaic.version = 11 : i64} {
  func.func @_st_gcn_kernel(%arg0: i32, %arg1: memref<8x32x16xf32, #tpu.memory_space<vmem>>, %arg2: memref<16x160xf32, #tpu.memory_space<vmem>>, %arg3: memref<1x160xf32, #tpu.memory_space<vmem>>, %arg4: memref<8x128x25xf32, #tpu.memory_space<vmem>>) attributes {dimension_semantics = [#tpu.dimension_semantics<parallel>], iteration_bounds = array<i64: 2>, scalar_prefetch = 0 : i64, scratch_operands = 0 : i64, tpu.core_type = #tpu.core_type<tc>, window_params = [{transform_indices = @transform_0, window_bounds = array<i64: 8, 32, 16>}, {pipeline_mode = #tpu.pipeline_mode<synchronous>, transform_indices = @transform_1, window_bounds = array<i64: 16, 160>}, {pipeline_mode = #tpu.pipeline_mode<synchronous>, transform_indices = @transform_2, window_bounds = array<i64: 1, 160>}, {transform_indices = @transform_3, window_bounds = array<i64: 8, 128, 25>}]} {
    %c0 = arith.constant 0 : index
    %c0_0 = arith.constant 0 : index
    %c0_1 = arith.constant 0 : index
    %0 = vector.load %arg1[%c0, %c0_0, %c0_1] : memref<8x32x16xf32, #tpu.memory_space<vmem>>, vector<8x32x16xf32>
    %1 = vector.shape_cast %0 : vector<8x32x16xf32> to vector<256x16xf32>
    %c0_2 = arith.constant 0 : index
    %c0_3 = arith.constant 0 : index
    %2 = vector.load %arg2[%c0_2, %c0_3] : memref<16x160xf32, #tpu.memory_space<vmem>>, vector<16x160xf32>
    %cst = arith.constant dense<0.000000e+00> : vector<256x160xf32>
    %3 = tpu.matmul %1, %2, %cst {dimension_numbers = #tpu.dot_dimension_numbers<[1], [0], [0], [1], [0, 0, 1, 1], [], []>} : vector<256x16xf32>, vector<16x160xf32>, vector<256x160xf32> -> vector<256x160xf32>
    %c0_4 = arith.constant 0 : index
    %c0_5 = arith.constant 0 : index
    %4 = vector.load %arg3[%c0_4, %c0_5] : memref<1x160xf32, #tpu.memory_space<vmem>>, vector<1x160xf32>
    %5 = vector.broadcast %4 : vector<1x160xf32> to vector<256x160xf32>
    %6 = arith.addf %3, %5 : vector<256x160xf32>
    %7 = vector.extract_strided_slice %6 {offsets = [0, 0], sizes = [256, 128], strides = [1, 1]} : vector<256x160xf32> to vector<256x128xf32>
    %8 = vector.shape_cast %7 : vector<256x128xf32> to vector<8x32x128xf32>
    %9 = vector.extract_strided_slice %6 {offsets = [0, 128], sizes = [256, 32], strides = [1, 1]} : vector<256x160xf32> to vector<256x32xf32>
    %10 = vector.shape_cast %9 : vector<256x32xf32> to vector<8x32x32xf32>
    %cst_6 = arith.constant dense<0.000000e+00> : vector<8x32x32xf32>
    %11 = tpu.matmul %10, %10, %cst_6 {dimension_numbers = #tpu.dot_dimension_numbers<[2], [2], [1], [1], [0, 0, 0, 1, 1, 1], [0], [0]>} : vector<8x32x32xf32>, vector<8x32x32xf32>, vector<8x32x32xf32> -> vector<8x32x32xf32>
    %12 = tpu.iota {dimensions = array<i32: 2>} : vector<1x1x32xi32>
    %13 = tpu.iota {dimensions = array<i32: 1>} : vector<1x32x1xi32>
    %c25_i32 = arith.constant 25 : i32
    %14 = vector.broadcast %c25_i32 : i32 to vector<1x1x32xi32>
    %15 = arith.cmpi slt, %12, %14 : vector<1x1x32xi32>
    %cst_7 = arith.constant -1.000000e+30 : f32
    %16 = vector.shape_cast %15 : vector<1x1x32xi1> to vector<1x1x32xi1>
    %17 = vector.broadcast %16 : vector<1x1x32xi1> to vector<8x32x32xi1>
    %18 = vector.broadcast %cst_7 : f32 to vector<8x32x32xf32>
    %19 = arith.select %17, %11, %18 : vector<8x32x32xi1>, vector<8x32x32xf32>
    %cst_8 = arith.constant dense<0xFF800000> : vector<8x32xf32>
    %20 = vector.multi_reduction <maximumf>, %19, %cst_8 [2] : vector<8x32x32xf32> to vector<8x32xf32>
    %21 = vector.shape_cast %20 : vector<8x32xf32> to vector<8x32x1xf32>
    %22 = vector.broadcast %21 : vector<8x32x1xf32> to vector<8x32x32xf32>
    %23 = arith.subf %19, %22 : vector<8x32x32xf32>
    %24 = math.exp %23 : vector<8x32x32xf32>
    %cst_9 = arith.constant dense<0.000000e+00> : vector<8x32xf32>
    %25 = vector.multi_reduction <add>, %24, %cst_9 [2] : vector<8x32x32xf32> to vector<8x32xf32>
    %26 = vector.shape_cast %25 : vector<8x32xf32> to vector<8x32x1xf32>
    %27 = tpu.reciprocal %26 {approx = true} : vector<8x32x1xf32> -> vector<8x32x1xf32>
    %28 = vector.broadcast %27 : vector<8x32x1xf32> to vector<8x32x32xf32>
    %29 = arith.mulf %24, %28 : vector<8x32x32xf32>
    %c25_i32_10 = arith.constant 25 : i32
    %30 = vector.broadcast %c25_i32_10 : i32 to vector<1x32x1xi32>
    %31 = arith.cmpi slt, %13, %30 : vector<1x32x1xi32>
    %cst_11 = arith.constant 0.000000e+00 : f32
    %32 = vector.shape_cast %31 : vector<1x32x1xi1> to vector<1x32x1xi1>
    %33 = vector.broadcast %32 : vector<1x32x1xi1> to vector<8x32x32xi1>
    %34 = vector.broadcast %cst_11 : f32 to vector<8x32x32xf32>
    %35 = arith.select %33, %29, %34 : vector<8x32x32xi1>, vector<8x32x32xf32>
    %cst_12 = arith.constant dense<0.000000e+00> : vector<8x128x32xf32>
    %36 = tpu.matmul %8, %35, %cst_12 {dimension_numbers = #tpu.dot_dimension_numbers<[1], [1], [2], [2], [0, 0, 0, 2, 1, 2], [0], [0]>} : vector<8x32x128xf32>, vector<8x32x32xf32>, vector<8x128x32xf32> -> vector<8x128x32xf32>
    %37 = vector.extract_strided_slice %36 {offsets = [0, 0, 0], sizes = [8, 128, 25], strides = [1, 1, 1]} : vector<8x128x32xf32> to vector<8x128x25xf32>
    %c0_13 = arith.constant 0 : index
    %c0_14 = arith.constant 0 : index
    %c0_15 = arith.constant 0 : index
    %38 = vector.load %arg4[%c0_13, %c0_14, %c0_15] : memref<8x128x25xf32, #tpu.memory_space<vmem>>, vector<8x128x25xf32>
    tpu.vector_store %arg4[%c0_13, %c0_14, %c0_15], %37 {strides = array<i32>} : memref<8x128x25xf32, #tpu.memory_space<vmem>>, vector<8x128x25xf32>,
    return
  }
  func.func @transform_0(%arg0: i32) -> (i32, i32, i32) {
    %c0_i32 = arith.constant 0 : i32
    %c0_i32_0 = arith.constant 0 : i32
    %c0_i32_1 = arith.constant 0 : i32
    return %arg0, %c0_i32, %c0_i32_0 : i32, i32, i32
  }
  func.func @transform_1(%arg0: i32) -> (i32, i32) {
    %c0_i32 = arith.constant 0 : i32
    %c0_i32_0 = arith.constant 0 : i32
    %c0_i32_1 = arith.constant 0 : i32
    return %c0_i32, %c0_i32_0 : i32, i32
  }
  func.func @transform_2(%arg0: i32) -> (i32, i32) {
    %c0_i32 = arith.constant 0 : i32
    %c0_i32_0 = arith.constant 0 : i32
    %c0_i32_1 = arith.constant 0 : i32
    return %c0_i32, %c0_i32_0 : i32, i32
  }
  func.func @transform_3(%arg0: i32) -> (i32, i32, i32) {
    %c0_i32 = arith.constant 0 : i32
    %c0_i32_0 = arith.constant 0 : i32
    %c0_i32_1 = arith.constant 0 : i32
    return %arg0, %c0_i32, %c0_i32_0 : i32, i32, i32
  }
}

</mosaic_0001>

<bundles_post_ra>
// kernel: tpu_custom_call.1
= control target key start
LH: loop header
LB: loop body
LE: loop exit
PB: predicated region body
PF: predicated region fallthrough
CT: control target
= control target key end

     0   :  { %s4970_s12 = smov 0   ;;  %s6348_s0 = inlined_call_operand.vmem [shape: f32[16,32,16], index: 0, kind: input, shape index: {}]   ;;  %s6349_s1 = inlined_call_operand.vmem [shape: f32[16,160], index: 1, kind: input, shape index: {}]   ;;  %s6350_s2 = inlined_call_operand.vmem [shape: f32[1,160], index: 2, kind: input, shape index: {}]   ;;  %s6351_s3 = inlined_call_operand.vmem [shape: f32[16,128,25], index: 3, kind: output, shape index: {}]  }
   0x1 LB: > { %s3783_s13 = sadd.s32 4294967295, %s4946_s12   ;;  %p3787_p0 = scmp.ge.s32.totalorder %s4946_s12, 1  ;;  %s4946_s12 = sphi %s4970_s12, %s13_s12  }
   0x2   : > { %p139_p1 = scmp.lt.s32.totalorder %s4946_s12, 3 }
   0x4   : > { %p140_p2 = pnand %p3787_p0, %p139_p1 }
   0x6   : > { %143 = sbr.rel (%p140_p2) target bundleno = 1330 (0x532), region = 32 }
   0xd   : > { %v212_v0 = vld [vmem:[%s6349_s1 + $0x8] sm:$0xff]  ;;  %v214_v1 = vld [vmem:[%s6349_s1 + $0x18] sm:$0xff]  ;;  %v211_v2 = vld [vmem:[%s6349_s1] sm:$0xff]  ;;  %s3788_s20 = sshll.u32 %s3783_s13, 3  ;;  %v4948_v5 = vmov 0.0   ;;  %vm227_vm0 = vcmask 130048   ;;  %v217_v39 = vlaneseq }
   0xe   : > { %v4622_v3 = vpack.c.bf16 %v214_v1, %v212_v0  ;;  %v213_v4 = vld [vmem:[%s6349_s1 + $0x10] sm:$0xff]  ;;  %388 = vmatprep.mubr.f32.mxu0 %v4948_v5  ;;  %p166_p3 = scmp.lt.s32.totalorder %s3788_s20, 15  ;;  %v215_v42 = vld [vmem:[%s6350_s2] sm:$0x3]  ;;  %vm581_vm1 = vcmask 261120   ;;  %vm4949_vm5 = vmmov 1  }
   0xf   : > { %v4624_v6 = vpack.c.bf16 %v213_v4, %v211_v2  ;;  %v5095_v40 = vshrl.u32 %v217_v39, 7  ;;  %vm5113_vm2 = vmpackc.low %vm581_vm1, %vm581_vm1  ;;  %vm3596_vm7 = vcmask 203776  }
  0x10   : > { %4623 = vmatprep.subr.bf16.mxu0 %v4622_v3  ;;  %s6487_s20 = smov (!%p166_p3, %s3788_s20), 15 }
  0x11   : > { %4625 = vmatpush1.bf16.msra.mxu0 %v4624_v6  ;;  %s4028_s23 = sshll.u32 %s6487_s20, 5  ;;  %v219_v41 = vsub.s32 0, %v5095_v40  ;;  %v223_v43 = vsub.s32 1, %v5095_v40  ;;  %s4029_s29 = sshll.u32 %s6487_s20, 7 }
  0x12   : > { %s4997_s26 = scalar_lea.vmem %s6348_s0, %s4028_s23  ;;  %s6039_s5 = scalar_lea.vmem %s6351_s3, %s4029_s29 }
  0x13   : > { %v179_v7 = vld [vmem:[%s4997_s26] sm:$0xff]  ;;  %v180_v8 = vld [vmem:[%s4997_s26 + $0x8] sm:$0xff]  ;;  %v181_v9 = vld [vmem:[%s4997_s26 + $0x10] sm:$0xff]  ;;  %v5102_v44 = vrot.slane %v215_v42, %v219_v41  ;;  %v5104_v45 = vrot.slane %v215_v42, %v223_v43 }
  0x14   : > { %3794 = vmatmul.mubr.msk.f32.vlgmr.msra.gmra.mrb[0].mxu0 %vm227_vm0, %v179_v7  ;;  %v182_v10 = vld [vmem:[%s4997_s26 + $0x18] sm:$0xff]  ;;  %v183_v11 = vld [vmem:[%s4997_s26 + $0x20] sm:$0xff]  ;;  %v184_v12 = vld [vmem:[%s4997_s26 + $0x28] sm:$0xff] }
  0x15   : > { %394 = vmatprep.mubr.f32.mxu0 %v4948_v5  ;;  %v185_v13 = vld [vmem:[%s4997_s26 + $0x30] sm:$0xff]  ;;  %v186_v14 = vld [vmem:[%s4997_s26 + $0x38] sm:$0xff]  ;;  %v187_v15 = vld [vmem:[%s4997_s26 + $0x40] sm:$0xff] }
  0x16   : > { %v188_v16 = vld [vmem:[%s4997_s26 + $0x48] sm:$0xff]  ;;  %v189_v17 = vld [vmem:[%s4997_s26 + $0x50] sm:$0xff]  ;;  %v190_v18 = vld [vmem:[%s4997_s26 + $0x58] sm:$0xff] }
  0x17   : > { %v191_v19 = vld [vmem:[%s4997_s26 + $0x60] sm:$0xff]  ;;  %v192_v20 = vld [vmem:[%s4997_s26 + $0x68] sm:$0xff]  ;;  %v193_v21 = vld [vmem:[%s4997_s26 + $0x70] sm:$0xff] }
  0x18   : > { %3795 = vmatmul.mubr.msk.f32.gmra.mrb[2].mxu0 %vm227_vm0, %v180_v8  ;;  %v194_v22 = vld [vmem:[%s4997_s26 + $0x78] sm:$0xff]  ;;  %v195_v23 = vld [vmem:[%s4997_s26 + $0x80] sm:$0xff]  ;;  %v196_v24 = vld [vmem:[%s4997_s26 + $0x88] sm:$0xff] }
  0x19   : > { %400 = vmatprep.mubr.f32.mxu0 %v4948_v5  ;;  %v197_v25 = vld [vmem:[%s4997_s26 + $0x90] sm:$0xff]  ;;  %v198_v26 = vld [vmem:[%s4997_s26 + $0x98] sm:$0xff]  ;;  %v199_v27 = vld [vmem:[%s4997_s26 + $0xa0] sm:$0xff] }
  0x1a   : > { %v200_v28 = vld [vmem:[%s4997_s26 + $0xa8] sm:$0xff]  ;;  %v201_v29 = vld [vmem:[%s4997_s26 + $0xb0] sm:$0xff]  ;;  %v202_v30 = vld [vmem:[%s4997_s26 + $0xb8] sm:$0xff] }
  0x1b   : > { %v203_v31 = vld [vmem:[%s4997_s26 + $0xc0] sm:$0xff]  ;;  %v204_v32 = vld [vmem:[%s4997_s26 + $0xc8] sm:$0xff]  ;;  %v205_v33 = vld [vmem:[%s4997_s26 + $0xd0] sm:$0xff] }
  0x1c   : > { %3796 = vmatmul.mubr.msk.f32.gmra.mrb[4].mxu0 %vm227_vm0, %v181_v9  ;;  %v206_v34 = vld [vmem:[%s4997_s26 + $0xd8] sm:$0xff]  ;;  %v207_v35 = vld [vmem:[%s4997_s26 + $0xe0] sm:$0xff]  ;;  %v208_v36 = vld [vmem:[%s4997_s26 + $0xe8] sm:$0xff] }
  0x1d   : > { %406 = vmatprep.mubr.f32.mxu0 %v4948_v5  ;;  %v209_v37 = vld [vmem:[%s4997_s26 + $0xf0] sm:$0xff]  ;;  %v210_v38 = vld [vmem:[%s4997_s26 + $0xf8] sm:$0xff] }
  0x20   : > { %3797 = vmatmul.mubr.msk.f32.gmra.mrb[6].mxu0 %vm227_vm0, %v182_v10 }
  0x21   : > { %412 = vmatprep.mubr.f32.mxu0 %v4948_v5 }
  0x24   : > { %3798 = vmatmul.mubr.msk.f32.gmra.mrb[8].mxu0 %vm227_vm0, %v183_v11 }
  0x25   : > { %418 = vmatprep.mubr.f32.mxu0 %v4948_v5 }
  0x28   : > { %3799 = vmatmul.mubr.msk.f32.gmra.mrb[10].mxu0 %vm227_vm0, %v184_v12 }
  0x29   : > { %424 = vmatprep.mubr.f32.mxu0 %v4948_v5 }
  0x2c   : > { %3800 = vmatmul.mubr.msk.f32.gmra.mrb[12].mxu0 %vm227_vm0, %v185_v13 }
  0x2d   : > { %430 = vmatprep.mubr.f32.mxu0 %v4948_v5 }
  0x30   : > { %3801 = vmatmul.mubr.msk.f32.gmra.mrb[14].mxu0 %vm227_vm0, %v186_v14 }
  0x31   : > { %436 = vmatprep.mubr.f32.mxu0 %v4948_v5 }
  0x34   : > { %3802 = vmatmul.mubr.msk.f32.gmra.mrb[16].mxu0 %vm227_vm0, %v187_v15 }
  0x35   : > { %442 = vmatprep.mubr.f32.mxu0 %v4948_v5 }
  0x38   : > { %3803 = vmatmul.mubr.msk.f32.gmra.mrb[18].mxu0 %vm227_vm0, %v188_v16 }
  0x39   : > { %448 = vmatprep.mubr.f32.mxu0 %v4948_v5 }
  0x3c   : > { %3804 = vmatmul.mubr.msk.f32.gmra.mrb[20].mxu0 %vm227_vm0, %v189_v17 }
  0x3d   : > { %454 = vmatprep.mubr.f32.mxu0 %v4948_v5 }
  0x40   : > { %3805 = vmatmul.mubr.msk.f32.gmra.mrb[22].mxu0 %vm227_vm0, %v190_v18 }
  0x41   : > { %460 = vmatprep.mubr.f32.mxu0 %v4948_v5 }
  0x44   : > { %3806 = vmatmul.mubr.msk.f32.gmra.mrb[24].mxu0 %vm227_vm0, %v191_v19 }
  0x45   : > { %466 = vmatprep.mubr.f32.mxu0 %v4948_v5 }
  0x48   : > { %3807 = vmatmul.mubr.msk.f32.gmra.mrb[26].mxu0 %vm227_vm0, %v192_v20 }
  0x49   : > { %472 = vmatprep.mubr.f32.mxu0 %v4948_v5 }
  0x4c   : > { %3808 = vmatmul.mubr.msk.f32.gmra.mrb[28].mxu0 %vm227_vm0, %v193_v21 }
  0x4d   : > { %478 = vmatprep.mubr.f32.mxu0 %v4948_v5 }
  0x50   : > { %3809 = vmatmul.mubr.msk.f32.gmra.mrb[30].mxu0 %vm227_vm0, %v194_v22 }
  0x51   : > { %484 = vmatprep.mubr.f32.mxu0 %v4948_v5 }
  0x54   : > { %3810 = vmatmul.mubr.msk.f32.gmra.mrb[32].mxu0 %vm227_vm0, %v195_v23 }
  0x55   : > { %490 = vmatprep.mubr.f32.mxu0 %v4948_v5 }
  0x58   : > { %3811 = vmatmul.mubr.msk.f32.gmra.mrb[34].mxu0 %vm227_vm0, %v196_v24 }
  0x59   : > { %496 = vmatprep.mubr.f32.mxu0 %v4948_v5 }
  0x5c   : > { %3812 = vmatmul.mubr.msk.f32.gmra.mrb[36].mxu0 %vm227_vm0, %v197_v25 }
  0x5d   : > { %502 = vmatprep.mubr.f32.mxu0 %v4948_v5 }
  0x60   : > { %3813 = vmatmul.mubr.msk.f32.gmra.mrb[38].mxu0 %vm227_vm0, %v198_v26 }
  0x61   : > { %508 = vmatprep.mubr.f32.mxu0 %v4948_v5 }
  0x64   : > { %3814 = vmatmul.mubr.msk.f32.gmra.mrb[40].mxu0 %vm227_vm0, %v199_v27 }
  0x65   : > { %514 = vmatprep.mubr.f32.mxu0 %v4948_v5 }
  0x68   : > { %3815 = vmatmul.mubr.msk.f32.gmra.mrb[42].mxu0 %vm227_vm0, %v200_v28 }
  0x69   : > { %520 = vmatprep.mubr.f32.mxu0 %v4948_v5 }
  0x6c   : > { %3816 = vmatmul.mubr.msk.f32.gmra.mrb[44].mxu0 %vm227_vm0, %v201_v29 }
  0x6d   : > { %526 = vmatprep.mubr.f32.mxu0 %v4948_v5 }
  0x70   : > { %3817 = vmatmul.mubr.msk.f32.gmra.mrb[46].mxu0 %vm227_vm0, %v202_v30 }
  0x71   : > { %532 = vmatprep.mubr.f32.mxu0 %v4948_v5 }
  0x74   : > { %3818 = vmatmul.mubr.msk.f32.gmra.mrb[48].mxu0 %vm227_vm0, %v203_v31 }
  0x75   : > { %538 = vmatprep.mubr.f32.mxu0 %v4948_v5 }
  0x78   : > { %3819 = vmatmul.mubr.msk.f32.gmra.mrb[50].mxu0 %vm227_vm0, %v204_v32 }
  0x79   : > { %544 = vmatprep.mubr.f32.mxu0 %v4948_v5 }
  0x7c   : > { %3820 = vmatmul.mubr.msk.f32.gmra.mrb[52].mxu0 %vm227_vm0, %v205_v33 }
  0x7d   : > { %550 = vmatprep.mubr.f32.mxu0 %v4948_v5 }
  0x80   : > { %3821 = vmatmul.mubr.msk.f32.gmra.mrb[54].mxu0 %vm227_vm0, %v206_v34 }
  0x81   : > { %556 = vmatprep.mubr.f32.mxu0 %v4948_v5 }
  0x84   : > { %3822 = vmatmul.mubr.msk.f32.gmra.mrb[56].mxu0 %vm227_vm0, %v207_v35 }
  0x85   : > { %562 = vmatprep.mubr.f32.mxu0 %v4948_v5 }
  0x88   : > { %3823 = vmatmul.mubr.msk.f32.gmra.mrb[58].mxu0 %vm227_vm0, %v208_v36 }
  0x89   : > { %568 = vmatprep.mubr.f32.mxu0 %v4948_v5 }
  0x8c   : > { %3824 = vmatmul.mubr.msk.f32.gmra.mrb[60].mxu0 %vm227_vm0, %v209_v37 }
  0x8d   : > { %574 = vmatprep.mubr.f32.mxu0 %v4948_v5 }
  0x90   : > { %3825 = vmatmul.mubr.msk.f32.gmra.mrb[62].mxu0 %vm227_vm0, %v210_v38 }
  0xe7   : > { %v390_v46 = vpop.f32.mrb[0].mxu0 }
  0xe8   : > { %v392_v47 = vpop.f32.mrb[1].mxu0  ;;  %v391_v48 = vadd.f32 %v390_v46, %v5102_v44 }
  0xe9   : > { %v393_v49 = vadd.f32 %v392_v47, %v5104_v45 }
  0xea   : > { %1796 = vxpose.xlu0.b32.start [1/4] (short) %v391_v48, 128 }
  0xeb   : > { %v396_v50 = vpop.f32.mrb[2].mxu0  ;;  %4262 = vmatprep.mubr.msk.f32.mxu1 %vm581_vm1, %v393_v49 }
  0xec   : > { %v397_v51 = vadd.f32 %v396_v50, %v5102_v44  ;;  %v398_v52 = vpop.f32.mrb[3].mxu0 }
  0xed   : > { %v399_v53 = vadd.f32 %v398_v52, %v5104_v45 }
  0xee   : > { %1797 = vxpose.xlu0.b32.cont [2/4] (short) %v397_v51, 128 }
  0xef   : > { %v402_v55 = vpop.f32.mrb[4].mxu0  ;;  %v4626_v56 = vpack.c.bf16 %v399_v53, %v393_v49 }
  0xf0   : > { %v403_v57 = vadd.f32 %v402_v55, %v5102_v44  ;;  %v404_v58 = vpop.f32.mrb[5].mxu0 }
  0xf1   : > { %4628 = vmatprep.subr.msk.bf16.mxu1 %vm5113_vm2, %v4626_v56  ;;  %v405_v62 = vadd.f32 %v404_v58, %v5104_v45 }
  0xf2   : > { %4631 = vmatpush3.bf16.xpose.msk.msra.mxu1 %vm5113_vm2, %v4626_v56  ;;  %1798 = vxpose.xlu0.b32.cont [3/4] (short) %v403_v57, 128 }
  0xf3   : > { %v408_v59 = vpop.f32.mrb[6].mxu0 }
  0xf4   : > { %v409_v60 = vadd.f32 %v408_v59, %v5102_v44  ;;  %v410_v61 = vpop.f32.mrb[7].mxu0 }
  0xf5   : > { %v411_v63 = vadd.f32 %v410_v61, %v5104_v45 }
  0xf6   : > { %1799 = vxpose.xlu0.b32.end [4/4] (short) %v409_v60, 128 }
  0xf7   : > { %v4632_v0 = vpack.c.bf16 %v411_v63, %v405_v62  ;;  %v414_v1 = vpop.f32.mrb[8].mxu0 }
  0xf8   : > { %v416_v2 = vpop.f32.mrb[9].mxu0  ;;  %v415_v3 = vadd.f32 %v414_v1, %v5102_v44 }
  0xf9   : > { %4634 = vmatprep.subr.msk.bf16.mxu1 %vm5113_vm2, %v4632_v0  ;;  %v417_v7 = vadd.f32 %v416_v2, %v5104_v45 }
  0xfa   : > { %2021 = vxpose.xlu1.b32.start [1/4] (short) %v415_v3, 128  ;;  %4637 = vmatpush3.bf16.xpose.msk.msra.mxu1 %vm5113_vm2, %v4632_v0 }
  0xfb   : > { %v420_v4 = vpop.f32.mrb[10].mxu0 }
  0xfc   : > { %v421_v5 = vadd.f32 %v420_v4, %v5102_v44  ;;  %v422_v6 = vpop.f32.mrb[11].mxu0 }
  0xfd   : > { %v423_v8 = vadd.f32 %v422_v6, %v5104_v45 }
  0xfe   : > { %2022 = vxpose.xlu1.b32.cont [2/4] (short) %v421_v5, 128 }
  0xff   : > { %v4638_v9 = vpack.c.bf16 %v423_v8, %v417_v7  ;;  %v426_v10 = vpop.f32.mrb[12].mxu0 }
 0x100   : > { %v427_v11 = vadd.f32 %v426_v10, %v5102_v44  ;;  %v428_v12 = vpop.f32.mrb[13].mxu0 }
 0x101   : > { %4263 = vmatmul.mubr.msk.f32.vlgmr.msra.gmra.mrb[0].mxu1 %vm581_vm1, %v399_v53  ;;  %4640 = vmatprep.subr.msk.bf16.mxu1 %vm5113_vm2, %v4638_v9  ;;  %v429_v16 = vadd.f32 %v428_v12, %v5104_v45 }
 0x102   : > { %2023 = vxpose.xlu1.b32.cont [3/4] (short) %v427_v11, 128  ;;  %4265 = vmatprep.mubr.msk.f32.mxu1 %vm581_vm1, %v405_v62 }
 0x103   : > { %4643 = vmatpush3.bf16.xpose.msk.msra.mxu1 %vm5113_vm2, %v4638_v9  ;;  %v432_v13 = vpop.f32.mrb[14].mxu0 }
 0x104   : > { %v433_v14 = vadd.f32 %v432_v13, %v5102_v44  ;;  %v434_v15 = vpop.f32.mrb[15].mxu0 }
 0x105   : > { %v435_v17 = vadd.f32 %v434_v15, %v5104_v45  ;;  %4266 = vmatmul.mubr.msk.f32.gmra.mrb[2].mxu1 %vm581_vm1, %v411_v63 }
 0x106   : > { %2024 = vxpose.xlu1.b32.end [4/4] (short) %v433_v14, 128  ;;  %4276 = vmatprep.mubr.msk.f32.mxu1 %vm581_vm1, %v417_v7 }
 0x107   : > { %v4644_v18 = vpack.c.bf16 %v435_v17, %v429_v16  ;;  %v438_v19 = vpop.f32.mrb[16].mxu0 }
 0x108   : > { %v440_v20 = vpop.f32.mrb[17].mxu0  ;;  %v439_v48 = vadd.f32 %v438_v19, %v5102_v44 }
 0x109   : > { %4646 = vmatprep.subr.msk.bf16.mxu1 %vm5113_vm2, %v4644_v18  ;;  %v441_v23 = vadd.f32 %v440_v20, %v5104_v45 }
 0x10b   : > { %4649 = vmatpush3.bf16.xpose.msk.msra.mxu1 %vm5113_vm2, %v4644_v18  ;;  %v444_v21 = vpop.f32.mrb[18].mxu0 }
 0x10c   : > { %v446_v22 = vpop.f32.mrb[19].mxu0  ;;  %v445_v55 = vadd.f32 %v444_v21, %v5102_v44 }
 0x10d   : > { %v447_v24 = vadd.f32 %v446_v22, %v5104_v45 }
 0x10f   : > { %v4650_v25 = vpack.c.bf16 %v447_v24, %v441_v23  ;;  %v450_v26 = vpop.f32.mrb[20].mxu0 }
 0x110   : > { %v452_v27 = vpop.f32.mrb[21].mxu0  ;;  %v451_v58 = vadd.f32 %v450_v26, %v5102_v44 }
 0x111   : > { %4652 = vmatprep.subr.msk.bf16.mxu1 %vm5113_vm2, %v4650_v25  ;;  %v453_v30 = vadd.f32 %v452_v27, %v5104_v45 }
 0x112   : > { %4277 = vmatmul.mubr.msk.f32.vlgmr.msra.gmra.mrb[4].mxu1 %vm581_vm1, %v423_v8 }
 0x113   : > { %4279 = vmatprep.mubr.msk.f32.mxu1 %vm581_vm1, %v429_v16  ;;  %4655 = vmatpush3.bf16.xpose.msk.msra.mxu1 %vm5113_vm2, %v4650_v25  ;;  %v456_v28 = vpop.f32.mrb[22].mxu0 }
 0x114   : > { %v458_v29 = vpop.f32.mrb[23].mxu0  ;;  %v457_v0 = vadd.f32 %v456_v28, %v5102_v44 }
 0x115   : > { %v459_v31 = vadd.f32 %v458_v29, %v5104_v45 }
 0x116   : > { %4280 = vmatmul.mubr.msk.f32.gmra.mrb[6].mxu1 %vm581_vm1, %v435_v17 }
 0x117   : > { %v4656_v32 = vpack.c.bf16 %v459_v31, %v453_v30  ;;  %4290 = vmatprep.mubr.msk.f32.mxu1 %vm581_vm1, %v441_v23  ;;  %v462_v33 = vpop.f32.mrb[24].mxu0 }
 0x118   : > { %v464_v34 = vpop.f32.mrb[25].mxu0  ;;  %v463_v3 = vadd.f32 %v462_v33, %v5102_v44 }
 0x119   : > { %4658 = vmatprep.subr.msk.bf16.mxu1 %vm5113_vm2, %v4656_v32  ;;  %v465_v37 = vadd.f32 %v464_v34, %v5104_v45 }
 0x11b   : > { %4661 = vmatpush3.bf16.xpose.msk.msra.mxu1 %vm5113_vm2, %v4656_v32  ;;  %v468_v35 = vpop.f32.mrb[26].mxu0 }
 0x11c   : > { %v470_v36 = vpop.f32.mrb[27].mxu0  ;;  %v469_v9 = vadd.f32 %v468_v35, %v5102_v44 }
 0x11d   : > { %v471_v38 = vadd.f32 %v470_v36, %v5104_v45 }
 0x11f   : > { %v4662_v41 = vpack.c.bf16 %v471_v38, %v465_v37  ;;  %v474_v42 = vpop.f32.mrb[28].mxu0 }
 0x120   : > { %v476_v43 = vpop.f32.mrb[29].mxu0  ;;  %v475_v12 = vadd.f32 %v474_v42, %v5102_v44 }
 0x121   : > { %4664 = vmatprep.subr.msk.bf16.mxu1 %vm5113_vm2, %v4662_v41  ;;  %v477_v49 = vadd.f32 %v476_v43, %v5104_v45 }
 0x122   : > { %4291 = vmatmul.mubr.msk.f32.vlgmr.msra.gmra.mrb[8].mxu1 %vm581_vm1, %v447_v24 }
 0x123   : > { %4293 = vmatprep.mubr.msk.f32.mxu1 %vm581_vm1, %v453_v30  ;;  %4667 = vmatpush3.bf16.xpose.msk.msra.mxu1 %vm5113_vm2, %v4662_v41  ;;  %v480_v46 = vpop.f32.mrb[30].mxu0 }
 0x124   : > { %v482_v47 = vpop.f32.mrb[31].mxu0  ;;  %v481_v18 = vadd.f32 %v480_v46, %v5102_v44 }
 0x125   : > { %v483_v50 = vadd.f32 %v482_v47, %v5104_v45 }
 0x126   : > { %4294 = vmatmul.mubr.msk.f32.gmra.mrb[10].mxu1 %vm581_vm1, %v459_v31 }
 0x127   : > { %v4668_v51 = vpack.c.bf16 %v483_v50, %v477_v49  ;;  %4304 = vmatprep.mubr.msk.f32.mxu1 %vm581_vm1, %v465_v37  ;;  %v5178_v52 = vpop.f32.mrb[32].mxu0  ;;  %2246 = vxpose.xlu0.b32.start [1/4] (short) %v439_v48, 128 }
 0x128   : > { %v488_v53 = vpop.f32.mrb[33].mxu0 }
 0x129   : > { %4670 = vmatprep.subr.msk.bf16.mxu1 %vm5113_vm2, %v4668_v51  ;;  %v489_v59 = vadd.f32 %v488_v53, %v5104_v45 }
 0x12b   : > { %4673 = vmatpush3.bf16.xpose.msk.msra.mxu1 %vm5113_vm2, %v4668_v51  ;;  %v5185_v56 = vpop.f32.mrb[34].mxu0  ;;  %2247 = vxpose.xlu0.b32.cont [2/4] (short) %v445_v55, 128 }
 0x12c   : > { %v494_v57 = vpop.f32.mrb[35].mxu0 }
 0x12d   : > { %v495_v60 = vadd.f32 %v494_v57, %v5104_v45 }
 0x12f   : > { %v4674_v61 = vpack.c.bf16 %v495_v60, %v489_v59  ;;  %v5190_v62 = vpop.f32.mrb[36].mxu0  ;;  %2248 = vxpose.xlu0.b32.cont [3/4] (short) %v451_v58, 128 }
 0x130   : > { %v500_v63 = vpop.f32.mrb[37].mxu0 }
 0x131   : > { %4676 = vmatprep.subr.msk.bf16.mxu1 %vm5113_vm2, %v4674_v61  ;;  %v501_v4 = vadd.f32 %v500_v63, %v5104_v45 }
 0x132   : > { %4305 = vmatmul.mubr.msk.f32.vlgmr.msra.gmra.mrb[12].mxu1 %vm581_vm1, %v471_v38 }
 0x133   : > { %4307 = vmatprep.mubr.msk.f32.mxu1 %vm581_vm1, %v477_v49  ;;  %4679 = vmatpush3.bf16.xpose.msk.msra.mxu1 %vm5113_vm2, %v4674_v61  ;;  %v5199_v1 = vpop.f32.mrb[38].mxu0 }
 0x134   : > { %2249 = vxpose.xlu0.b32.end [4/4] (short) %v457_v0, 128  ;;  %v506_v2 = vpop.f32.mrb[39].mxu0 }
 0x135   : > { %v507_v5 = vadd.f32 %v506_v2, %v5104_v45 }
 0x136   : > { %4308 = vmatmul.mubr.msk.f32.gmra.mrb[14].mxu1 %vm581_vm1, %v483_v50 }
 0x137   : > { %v4680_v6 = vpack.c.bf16 %v507_v5, %v501_v4  ;;  %4318 = vmatprep.mubr.msk.f32.mxu1 %vm581_vm1, %v489_v59  ;;  %v5206_v7 = vpop.f32.mrb[40].mxu0  ;;  %2471 = vxpose.xlu1.b32.start [1/4] (short) %v463_v3, 128 }
 0x138   : > { %v512_v8 = vpop.f32.mrb[41].mxu0 }
 0x139   : > { %4682 = vmatprep.subr.msk.bf16.mxu1 %vm5113_vm2, %v4680_v6  ;;  %v513_v13 = vadd.f32 %v512_v8, %v5104_v45 }
 0x13b   : > { %4685 = vmatpush3.bf16.xpose.msk.msra.mxu1 %vm5113_vm2, %v4680_v6  ;;  %v5213_v10 = vpop.f32.mrb[42].mxu0  ;;  %2472 = vxpose.xlu1.b32.cont [2/4] (short) %v469_v9, 128 }
 0x13c   : > { %v518_v11 = vpop.f32.mrb[43].mxu0 }
 0x13d   : > { %v519_v14 = vadd.f32 %v518_v11, %v5104_v45  ;;  %v5315_v11 = vand.u32 127, %v217_v39 }
 0x13f   : > { %v4686_v15 = vpack.c.bf16 %v519_v14, %v513_v13  ;;  %v5218_v16 = vpop.f32.mrb[44].mxu0  ;;  %2473 = vxpose.xlu1.b32.cont [3/4] (short) %v475_v12, 128  ;;  %vm1365_vm3 = vcmp.lt.s32.totalorder %v5315_v11, 25 }
 0x140   : > { %v524_v17 = vpop.f32.mrb[45].mxu0 }
 0x141   : > { %4688 = vmatprep.subr.msk.bf16.mxu1 %vm5113_vm2, %v4686_v15  ;;  %v525_v21 = vadd.f32 %v524_v17, %v5104_v45 }
 0x142   : > { %4319 = vmatmul.mubr.msk.f32.vlgmr.msra.gmra.mrb[16].mxu1 %vm581_vm1, %v495_v60 }
 0x143   : > { %4321 = vmatprep.mubr.msk.f32.mxu1 %vm581_vm1, %v501_v4  ;;  %4691 = vmatpush3.bf16.xpose.msk.msra.mxu1 %vm5113_vm2, %v4686_v15  ;;  %v5227_v19 = vpop.f32.mrb[46].mxu0 }
 0x144   : > { %2474 = vxpose.xlu1.b32.end [4/4] (short) %v481_v18, 128  ;;  %v530_v20 = vpop.f32.mrb[47].mxu0 }
 0x145   : > { %v531_v22 = vadd.f32 %v530_v20, %v5104_v45 }
 0x146   : > { %4322 = vmatmul.mubr.msk.f32.gmra.mrb[18].mxu1 %vm581_vm1, %v507_v5 }
 0x147   : > { %v4692_v23 = vpack.c.bf16 %v531_v22, %v525_v21  ;;  %4332 = vmatprep.mubr.msk.f32.mxu1 %vm581_vm1, %v513_v13  ;;  %v5233_v24 = vpop.f32.mrb[48].mxu0 }
 0x148   : > { %6362 = vst [vmem:[#allocation2_spill] sm:$0xff] %v5233_v24  ;;  %v536_v25 = vpop.f32.mrb[49].mxu0 }
 0x149   : > { %4694 = vmatprep.subr.msk.bf16.mxu1 %vm5113_vm2, %v4692_v23  ;;  %v537_v26 = vadd.f32 %v536_v25, %v5104_v45 }
 0x14b   : > { %4697 = vmatpush3.bf16.xpose.msk.msra.mxu1 %vm5113_vm2, %v4692_v23  ;;  %v5240_v27 = vpop.f32.mrb[50].mxu0 }
 0x14c   : > { %6363 = vst [vmem:[#allocation3_spill] sm:$0xff] %v5240_v27  ;;  %v542_v28 = vpop.f32.mrb[51].mxu0 }
 0x14d   : > { %v543_v29 = vadd.f32 %v542_v28, %v5104_v45 }
 0x14f   : > { %v4698_v30 = vpack.c.bf16 %v543_v29, %v537_v26  ;;  %v5243_v31 = vpop.f32.mrb[52].mxu0 }
 0x150   : > { %6364 = vst [vmem:[#allocation4_spill] sm:$0xff] %v5243_v31  ;;  %v548_v32 = vpop.f32.mrb[53].mxu0 }
 0x151   : > { %4700 = vmatprep.subr.msk.bf16.mxu1 %vm5113_vm2, %v4698_v30  ;;  %v549_v33 = vadd.f32 %v548_v32, %v5104_v45 }
 0x152   : > { %4333 = vmatmul.mubr.msk.f32.vlgmr.msra.gmra.mrb[20].mxu1 %vm581_vm1, %v519_v14 }
 0x153   : > { %4335 = vmatprep.mubr.msk.f32.mxu1 %vm581_vm1, %v525_v21  ;;  %4703 = vmatpush3.bf16.xpose.msk.msra.mxu1 %vm5113_vm2, %v4698_v30  ;;  %v5252_v34 = vpop.f32.mrb[54].mxu0 }
 0x154   : > { %6365 = vst [vmem:[#allocation5_spill] sm:$0xff] %v5252_v34  ;;  %v554_v35 = vpop.f32.mrb[55].mxu0 }
 0x155   : > { %v555_v36 = vadd.f32 %v554_v35, %v5104_v45 }
 0x156   : > { %4336 = vmatmul.mubr.msk.f32.gmra.mrb[22].mxu1 %vm581_vm1, %v531_v22 }
 0x157   : > { %v4704_v37 = vpack.c.bf16 %v555_v36, %v549_v33  ;;  %v5256_v38 = vpop.f32.mrb[56].mxu0  ;;  %4346 = vmatprep.mubr.msk.f32.mxu1 %vm581_vm1, %v537_v26 }
 0x158   : > { %6366 = vst [vmem:[#allocation6_spill] sm:$0xff] %v5256_v38  ;;  %v560_v41 = vpop.f32.mrb[57].mxu0 }
 0x159   : > { %4706 = vmatprep.subr.msk.bf16.mxu1 %vm5113_vm2, %v4704_v37  ;;  %v561_v42 = vadd.f32 %v560_v41, %v5104_v45 }
 0x15b   : > { %4709 = vmatpush3.bf16.xpose.msk.msra.mxu1 %vm5113_vm2, %v4704_v37  ;;  %v5264_v43 = vpop.f32.mrb[58].mxu0 }
 0x15c   : > { %6367 = vst [vmem:[#allocation7_spill] sm:$0xff] %v5264_v43  ;;  %v566_v46 = vpop.f32.mrb[59].mxu0 }
 0x15d   : > { %v567_v47 = vadd.f32 %v566_v46, %v5104_v45 }
 0x15f   : > { %v4710_v48 = vpack.c.bf16 %v567_v47, %v561_v42  ;;  %v5267_v49 = vpop.f32.mrb[60].mxu0 }
 0x160   : > { %6368 = vst [vmem:[#allocation8_spill] sm:$0xff] %v5267_v49  ;;  %v572_v50 = vpop.f32.mrb[61].mxu0 }
 0x161   : > { %4712 = vmatprep.subr.msk.bf16.mxu1 %vm5113_vm2, %v4710_v48  ;;  %v573_v51 = vadd.f32 %v572_v50, %v5104_v45 }
 0x162   : > { %4347 = vmatmul.mubr.msk.f32.vlgmr.msra.gmra.mrb[24].mxu1 %vm581_vm1, %v543_v29 }
 0x163   : > { %4715 = vmatpush3.bf16.xpose.msk.msra.mxu1 %vm5113_vm2, %v4710_v48  ;;  %v5275_v53 = vpop.f32.mrb[62].mxu0  ;;  %4349 = vmatprep.mubr.msk.f32.mxu1 %vm581_vm1, %v549_v33 }
 0x164   : > { %6369 = vst [vmem:[#allocation9_spill] sm:$0xff] %v5275_v53  ;;  %v578_v55 = vpop.f32.mrb[63].mxu0 }
 0x165   : > { %v579_v57 = vadd.f32 %v578_v55, %v5104_v45 }
 0x166   : > { %4350 = vmatmul.mubr.msk.f32.gmra.mrb[26].mxu1 %vm581_vm1, %v555_v36 }
 0x167   : > { %v4716_v58 = vpack.c.bf16 %v579_v57, %v573_v51  ;;  %4360 = vmatprep.mubr.msk.f32.mxu1 %vm581_vm1, %v561_v42 }
 0x169   : > { %4718 = vmatprep.subr.msk.bf16.mxu1 %vm5113_vm2, %v4716_v58 }
 0x16a   : > { %v1812_v59 = vpop.trf.xlu0 }
 0x16b   : > { %4721 = vmatpush3.bf16.xpose.msk.msra.mxu1 %vm5113_vm2, %v4716_v58  ;;  %4374 = vmatprep.mubr.msk.f32.mxu0 %vm581_vm1, %v1812_v59 }
 0x16e   : > { %v5290_v60 = vpop.trf.xlu0 }
 0x172   : > { %4361 = vmatmul.mubr.msk.f32.vlgmr.msra.gmra.mrb[28].mxu1 %vm581_vm1, %v567_v47  ;;  %v5294_v63 = vpop.trf.xlu0 }
 0x173   : > { %4363 = vmatprep.mubr.msk.f32.mxu1 %vm581_vm1, %v573_v51 }
 0x176   : > { %4364 = vmatmul.mubr.msk.f32.gmra.mrb[30].mxu1 %vm581_vm1, %v579_v57  ;;  %v5298_v54 = vpop.trf.xlu0 }
 0x17a   : > { %v2037_v45 = vpop.trf.xlu1  ;;  %v5302_v3 = vpop.trf.xlu0 }
 0x17b   : > { %4406 = vmatprep.mubr.msk.f32.mxu1 %vm581_vm1, %v2037_v45 }
 0x17e   : > { %v5292_v61 = vpop.trf.xlu1  ;;  %v5306_v5 = vpop.trf.xlu0 }
 0x182   : > { %v5296_v0 = vpop.trf.xlu1  ;;  %v5310_v8 = vpop.trf.xlu0 }
 0x186   : > { %v5300_v2 = vpop.trf.xlu1  ;;  %v5317_v12 = vpop.trf.xlu0 }
 0x18a   : > { %v5304_v4 = vpop.trf.xlu1  ;;  %v5322_v15 = vpop.trf.xlu0 }
 0x18e   : > { %v5308_v6 = vpop.trf.xlu1  ;;  %v5344_v29 = vpop.trf.xlu0 }
 0x18f   : > { %6370 = vst [vmem:[#allocation10_spill] sm:$0xff] %v5308_v6 }
 0x192   : > { %v5312_v9 = vpop.trf.xlu1  ;;  %v5354_v35 = vpop.trf.xlu0 }
 0x193   : > { %6371 = vst [vmem:[#allocation11_spill] sm:$0xff] %v5312_v9 }
 0x196   : > { %v5320_v13 = vpop.trf.xlu1  ;;  %v5362_v46 = vpop.trf.xlu0 }
 0x197   : > { %6372 = vst [vmem:[#allocation12_spill] sm:$0xff] %v5320_v13 }
 0x19a   : > { %v5334_v22 = vpop.trf.xlu1 }
 0x19b   : > { %6373 = vst [vmem:[#allocation13_spill] sm:$0xff] %v5334_v22 }
 0x19e   : > { %v5352_v33 = vpop.trf.xlu1 }
 0x19f   : > { %6374 = vst [vmem:[#allocation14_spill] sm:$0xff] %v5352_v33 }
 0x1a2   : > { %v5356_v36 = vpop.trf.xlu1 }
 0x1a3   : > { %6375 = vst [vmem:[#allocation15_spill] sm:$0xff] %v5356_v36 }
 0x1a6   : > { %v5370_v55 = vpop.trf.xlu1 }
 0x1a7   : > { %6376 = vst [vmem:[#allocation16_spill] sm:$0xff] %v5370_v55 }
 0x1d4   : > { %v4264_v14 = vpop.f32.mrb[0].mxu1 }
 0x1d5   : > { %v5326_v17 = vsel %vm1365_vm3, %v4264_v14, -1e+30  ;;  %v660_v18 = vpop.f32.mrb[1].mxu1  ;;  %v5384_v14 = vpop.trf.xlu0 }
 0x1d6   : > { %v1403_v20 = vsel %vm581_vm1, %v5326_v17, -inf  ;;  %v5332_v39 = vsel %vm1365_vm3, %v660_v18, -1e+30 }
 0x1d7   : > { %1404 = vmax.xlane.f32.xlu0 %v1403_v20  ;;  %v1400_v28 = vsel %vm581_vm1, %v5332_v39, -inf  ;;  %v5388_v20 = vpop.trf.xlu1 }
 0x1d8   : > { %v4267_v21 = vpop.f32.mrb[2].mxu1  ;;  %6377 = vst [vmem:[#allocation17_spill] sm:$0xff] %v5388_v20 }
 0x1d9   : > { %v5338_v23 = vsel %vm1365_vm3, %v4267_v21, -1e+30  ;;  %v670_v25 = vpop.f32.mrb[3].mxu1  ;;  %v5390_v21 = vpop.trf.xlu0 }
 0x1da   : > { %v1409_v26 = vsel %vm581_vm1, %v5338_v23, -inf  ;;  %v5348_v30 = vsel %vm1365_vm3, %v670_v25, -1e+30 }
 0x1db   : > { %1410 = vmax.xlane.f32.xlu1 %v1409_v26  ;;  %1401 = vmax.xlane.f32.xlu0 %v1400_v28  ;;  %v1406_v32 = vsel %vm581_vm1, %v5348_v30, -inf }
 0x1df   : > { %1407 = vmax.xlane.f32.xlu0 %v1406_v32  ;;  %v5396_v32 = vpop.trf.xlu1 }
 0x1e0   : > { %6378 = vst [vmem:[#allocation18_spill] sm:$0xff] %v5396_v32 }
 0x1e5   : > { %v4278_v37 = vpop.f32.mrb[4].mxu1 }
 0x1e6   : > { %v5360_v41 = vsel %vm1365_vm3, %v4278_v37, -1e+30  ;;  %v757_v42 = vpop.f32.mrb[5].mxu1 }
 0x1e7   : > { %v1415_v47 = vsel %vm581_vm1, %v5360_v41, -inf  ;;  %v5368_v48 = vsel %vm1365_vm3, %v757_v42, -1e+30 }
 0x1e8   : > { %1416 = vmax.xlane.f32.xlu1 %v1415_v47  ;;  %v1412_v58 = vsel %vm581_vm1, %v5368_v48, -inf }
 0x1e9   : > { %v4281_v50 = vpop.f32.mrb[6].mxu1 }
 0x1ea   : > { %v767_v51 = vpop.f32.mrb[7].mxu1  ;;  %v5380_v59 = vsel %vm1365_vm3, %v4281_v50, -1e+30  ;;  %v5406_v50 = vpop.trf.xlu0 }
 0x1eb   : > { %v5374_v57 = vsel %vm1365_vm3, %v767_v51, -1e+30  ;;  %v1421_v18 = vsel %vm581_vm1, %v5380_v59, -inf  ;;  %6379 = vst [vmem:[#allocation19_spill] sm:$0xff] %v5406_v50 }
 0x1ec   : > { %1413 = vmax.xlane.f32.xlu1 %v1412_v58  ;;  %v1418_v45 = vsel %vm581_vm1, %v5374_v57, -inf }
 0x1ed   : > { %1419 = vmax.xlane.f32.xlu0 %v1418_v45 }
 0x1f0   : > { %1422 = vmax.xlane.f32.xlu1 %v1421_v18 }
 0x1f5   : > { %v4292_v25 = vpop.f32.mrb[8].mxu1 }
 0x1f6   : > { %v5394_v26 = vsel %vm1365_vm3, %v4292_v25, -1e+30  ;;  %v854_v28 = vpop.f32.mrb[9].mxu1 }
 0x1f7   : > { %v5400_v37 = vsel %vm1365_vm3, %v854_v28, -1e+30  ;;  %v1427_v42 = vsel %vm581_vm1, %v5394_v26, -inf }
 0x1f8   : > { %1428 = vmax.xlane.f32.xlu1 %v1427_v42  ;;  %v1424_v47 = vsel %vm581_vm1, %v5400_v37, -inf  ;;  %v5420_v42 = vpop.trf.xlu1 }
 0x1f9   : > { %v4295_v51 = vpop.f32.mrb[10].mxu1  ;;  %1425 = vmax.xlane.f32.xlu0 %v1424_v47  ;;  %6380 = vst [vmem:[#allocation20_spill] sm:$0xff] %v5420_v42  ;;  %v5422_v47 = vpop.trf.xlu0 }
 0x1fa   : > { %v5410_v58 = vsel %vm1365_vm3, %v4295_v51, -1e+30  ;;  %v864_v45 = vpop.f32.mrb[11].mxu1  ;;  %6381 = vst [vmem:[#allocation21_spill] sm:$0xff] %v5422_v47 }
 0x1fb   : > { %v5414_v18 = vsel %vm1365_vm3, %v864_v45, -1e+30  ;;  %v1433_v25 = vsel %vm581_vm1, %v5410_v58, -inf }
 0x1fc   : > { %1434 = vmax.xlane.f32.xlu1 %v1433_v25  ;;  %v1430_v28 = vsel %vm581_vm1, %v5414_v18, -inf  ;;  %v5424_v53 = vpop.trf.xlu1 }
 0x1fd   : > { %1431 = vmax.xlane.f32.xlu0 %v1430_v28  ;;  %6382 = vst [vmem:[#allocation22_spill] sm:$0xff] %v5424_v53  ;;  %v5426_v51 = vpop.trf.xlu0 }
 0x1fe   : > { %6383 = vst [vmem:[#allocation23_spill] sm:$0xff] %v5426_v51 }
 0x200   : > { %v5440_v31 = vpop.trf.xlu1 }
 0x201   : > { %6384 = vst [vmem:[#allocation24_spill] sm:$0xff] %v5440_v31  ;;  %v5446_v24 = vpop.trf.xlu0 }
 0x202   : > { %6385 = vst [vmem:[#allocation25_spill] sm:$0xff] %v5446_v24 }
 0x205   : > { %v4306_v49 = vpop.f32.mrb[12].mxu1  ;;  %v5458_v53 = vpop.trf.xlu0 }
 0x206   : > { %v5430_v45 = vsel %vm1365_vm3, %v4306_v49, -1e+30  ;;  %v951_v34 = vpop.f32.mrb[13].mxu1  ;;  %6387 = vst [vmem:[#allocation27_spill] sm:$0xff] %v5458_v53 }
 0x207   : > { %v5434_v25 = vsel %vm1365_vm3, %v951_v34, -1e+30  ;;  %v1439_v43 = vsel %vm581_vm1, %v5430_v45, -inf }
 0x208   : > { %1440 = vmax.xlane.f32.xlu1 %v1439_v43  ;;  %v1436_v28 = vsel %vm581_vm1, %v5434_v25, -inf }
 0x209   : > { %v4309_v38 = vpop.f32.mrb[14].mxu1  ;;  %1437 = vmax.xlane.f32.xlu0 %v1436_v28  ;;  %v5456_v28 = vpop.trf.xlu1 }
 0x20a   : > { %v5444_v49 = vsel %vm1365_vm3, %v4309_v38, -1e+30  ;;  %v961_v27 = vpop.f32.mrb[15].mxu1  ;;  %6386 = vst [vmem:[#allocation26_spill] sm:$0xff] %v5456_v28  ;;  %v5466_v20 = vpop.trf.xlu0 }
 0x20b   : > { %v5450_v34 = vsel %vm1365_vm3, %v961_v27, -1e+30  ;;  %v1445_v43 = vsel %vm581_vm1, %v5444_v49, -inf  ;;  %6389 = vst [vmem:[#allocation29_spill] sm:$0xff] %v5466_v20 }
 0x20c   : > { %1446 = vmax.xlane.f32.xlu1 %v1445_v43  ;;  %v1442_v31 = vsel %vm581_vm1, %v5450_v34, -inf }
 0x20d   : > { %1443 = vmax.xlane.f32.xlu0 %v1442_v31  ;;  %v5460_v38 = vpop.trf.xlu1 }
 0x20e   : > { %6388 = vst [vmem:[#allocation28_spill] sm:$0xff] %v5460_v38  ;;  %v5490_v53 = vpop.trf.xlu0 }
 0x20f   : > { %6391 = vst [vmem:[#allocation31_spill] sm:$0xff] %v5490_v53 }
 0x211   : > { %v5480_v36 = vpop.trf.xlu1 }
 0x212   : > { %6390 = vst [vmem:[#allocation30_spill] sm:$0xff] %v5480_v36 }
 0x215   : > { %v4320_v42 = vpop.f32.mrb[16].mxu1 }
 0x216   : > { %v5464_v32 = vsel %vm1365_vm3, %v4320_v42, -1e+30  ;;  %v1048_v27 = vpop.f32.mrb[17].mxu1 }
 0x217   : > { %v5470_v43 = vsel %vm1365_vm3, %v1048_v27, -1e+30  ;;  %v1451_v31 = vsel %vm581_vm1, %v5464_v32, -inf }
 0x218   : > { %1452 = vmax.xlane.f32.xlu1 %v1451_v31  ;;  %v1448_v28 = vsel %vm581_vm1, %v5470_v43, -inf }
 0x219   : > { %v4323_v38 = vpop.f32.mrb[18].mxu1  ;;  %1449 = vmax.xlane.f32.xlu0 %v1448_v28  ;;  %v5492_v28 = vpop.trf.xlu1 }
 0x21a   : > { %v5478_v42 = vsel %vm1365_vm3, %v4323_v38, -1e+30  ;;  %v1058_v55 = vpop.f32.mrb[19].mxu1  ;;  %6392 = vst [vmem:[#allocation32_spill] sm:$0xff] %v5492_v28  ;;  %v5494_v38 = vpop.trf.xlu0 }
 0x21b   : > { %v5484_v27 = vsel %vm1365_vm3, %v1058_v55, -1e+30  ;;  %v1457_v20 = vsel %vm581_vm1, %v5478_v42, -inf  ;;  %6393 = vst [vmem:[#allocation33_spill] sm:$0xff] %v5494_v38 }
 0x21c   : > { %1458 = vmax.xlane.f32.xlu1 %v1457_v20  ;;  %v1454_v31 = vsel %vm581_vm1, %v5484_v27, -inf }
 0x21d   : > { %1455 = vmax.xlane.f32.xlu0 %v1454_v31  ;;  %v5500_v24 = vpop.trf.xlu1 }
 0x21e   : > { %6394 = vst [vmem:[#allocation34_spill] sm:$0xff] %v5500_v24  ;;  %v5510_v28 = vpop.trf.xlu0 }
 0x21f   : > { %6395 = vst [vmem:[#allocation35_spill] sm:$0xff] %v5510_v28 }
 0x221   : > { %v5524_v51 = vpop.trf.xlu1 }
 0x222   : > { %6396 = vst [vmem:[#allocation36_spill] sm:$0xff] %v5524_v51 }
 0x225   : > { %v4334_v33 = vpop.f32.mrb[20].mxu1  ;;  %v5528_v28 = vpop.trf.xlu1 }
 0x226   : > { %v5498_v36 = vsel %vm1365_vm3, %v4334_v33, -1e+30  ;;  %v1145_v55 = vpop.f32.mrb[21].mxu1  ;;  %6398 = vst [vmem:[#allocation38_spill] sm:$0xff] %v5528_v28 }
 0x227   : > { %v5504_v20 = vsel %vm1365_vm3, %v1145_v55, -1e+30  ;;  %v1463_v53 = vsel %vm581_vm1, %v5498_v36, -inf }
 0x228   : > { %1464 = vmax.xlane.f32.xlu1 %v1463_v53  ;;  %v1460_v31 = vsel %vm581_vm1, %v5504_v20, -inf }
 0x229   : > { %v4337_v38 = vpop.f32.mrb[22].mxu1  ;;  %1461 = vmax.xlane.f32.xlu0 %v1460_v31  ;;  %v5526_v31 = vpop.trf.xlu0 }
 0x22a   : > { %v5514_v33 = vsel %vm1365_vm3, %v4337_v38, -1e+30  ;;  %v1155_v24 = vpop.f32.mrb[23].mxu1  ;;  %6397 = vst [vmem:[#allocation37_spill] sm:$0xff] %v5526_v31  ;;  %v5544_v28 = vpop.trf.xlu1 }
 0x22b   : > { %v5518_v55 = vsel %vm1365_vm3, %v1155_v24, -1e+30  ;;  %v1469_v22 = vsel %vm581_vm1, %v5514_v33, -inf  ;;  %6402 = vst [vmem:[#allocation42_spill] sm:$0xff] %v5544_v28 }
 0x22c   : > { %1470 = vmax.xlane.f32.xlu1 %v1469_v22  ;;  %v1466_v53 = vsel %vm581_vm1, %v5518_v55, -inf }
 0x22d   : > { %1467 = vmax.xlane.f32.xlu0 %v1466_v53  ;;  %v5530_v38 = vpop.trf.xlu0 }
 0x22e   : > { %6399 = vst [vmem:[#allocation39_spill] sm:$0xff] %v5530_v38 }
 0x231   : > { %v5550_v9 = vpop.trf.xlu0 }
 0x232   : > { %6404 = vst [vmem:[#allocation44_spill] sm:$0xff] %v5550_v9 }
 0x235   : > { %v4348_v13 = vpop.f32.mrb[24].mxu1 }
 0x236   : > { %v5534_v24 = vsel %vm1365_vm3, %v4348_v13, -1e+30  ;;  %v1242_v47 = vpop.f32.mrb[25].mxu1 }
 0x237   : > { %6400 = vst [vmem:[#allocation40_spill] sm:$0xff] %v5534_v24  ;;  %v5538_v22 = vsel %vm1365_vm3, %v1242_v47, -1e+30  ;;  %v1475_v51 = vsel %vm581_vm1, %v5534_v24, -inf }
 0x238   : > { %6401 = vst [vmem:[#allocation41_spill] sm:$0xff] %v5538_v22  ;;  %1476 = vmax.xlane.f32.xlu1 %v1475_v51  ;;  %v1472_v53 = vsel %vm581_vm1, %v5538_v22, -inf  ;;  %v5562_v22 = vpop.trf.xlu0 }
 0x239   : > { %v4351_v38 = vpop.f32.mrb[26].mxu1  ;;  %1473 = vmax.xlane.f32.xlu0 %v1472_v53  ;;  %v5560_v53 = vpop.trf.xlu1  ;;  %6407 = vst [vmem:[#allocation47_spill] sm:$0xff] %v5562_v22 }
 0x23a   : > { %v5548_v13 = vsel %vm1365_vm3, %v4351_v38, -1e+30  ;;  %v1252_v31 = vpop.f32.mrb[27].mxu1  ;;  %6406 = vst [vmem:[#allocation46_spill] sm:$0xff] %v5560_v53 }
 0x23b   : > { %6403 = vst [vmem:[#allocation43_spill] sm:$0xff] %v5548_v13  ;;  %v5554_v47 = vsel %vm1365_vm3, %v1252_v31, -1e+30  ;;  %v1481_v51 = vsel %vm581_vm1, %v5548_v13, -inf }
 0x23c   : > { %6405 = vst [vmem:[#allocation45_spill] sm:$0xff] %v5554_v47  ;;  %1482 = vmax.xlane.f32.xlu1 %v1481_v51  ;;  %v1478_v28 = vsel %vm581_vm1, %v5554_v47, -inf  ;;  %v5570_v50 = vpop.trf.xlu0 }
 0x23d   : > { %1479 = vmax.xlane.f32.xlu0 %v1478_v28  ;;  %v5564_v38 = vpop.trf.xlu1  ;;  %6410 = vst [vmem:[#allocation50_spill] sm:$0xff] %v5570_v50 }
 0x23e   : > { %6408 = vst [vmem:[#allocation48_spill] sm:$0xff] %v5564_v38 }
 0x241   : > { %v5584_v47 = vpop.trf.xlu1 }
 0x242   : > { %6413 = vst [vmem:[#allocation53_spill] sm:$0xff] %v5584_v47 }
 0x245   : > { %v4362_v24 = vpop.f32.mrb[28].mxu1 }
 0x246   : > { %v5568_v9 = vsel %vm1365_vm3, %v4362_v24, -1e+30  ;;  %v1339_v31 = vpop.f32.mrb[29].mxu1 }
 0x247   : > { %6409 = vst [vmem:[#allocation49_spill] sm:$0xff] %v5568_v9  ;;  %v5574_v51 = vsel %vm1365_vm3, %v1339_v31, -1e+30  ;;  %v1487_v28 = vsel %vm581_vm1, %v5568_v9, -inf }
 0x248   : > { %6411 = vst [vmem:[#allocation51_spill] sm:$0xff] %v5574_v51  ;;  %1488 = vmax.xlane.f32.xlu1 %v1487_v28  ;;  %v1484_v53 = vsel %vm581_vm1, %v5574_v51, -inf  ;;  %v5594_v51 = vpop.trf.xlu0 }
 0x249   : > { %v4365_v38 = vpop.f32.mrb[30].mxu1  ;;  %1485 = vmax.xlane.f32.xlu0 %v1484_v53  ;;  %6415 = vst [vmem:[#allocation55_spill] sm:$0xff] %v5594_v51  ;;  %v5596_v53 = vpop.trf.xlu1 }
 0x24a   : > { %v5582_v24 = vsel %vm1365_vm3, %v4365_v38, -1e+30  ;;  %v1349_v22 = vpop.f32.mrb[31].mxu1  ;;  %6416 = vst [vmem:[#allocation56_spill] sm:$0xff] %v5596_v53 }
 0x24b   : > { %6412 = vst [vmem:[#allocation52_spill] sm:$0xff] %v5582_v24  ;;  %v5588_v31 = vsel %vm1365_vm3, %v1349_v22, -1e+30  ;;  %v1493_v50 = vsel %vm581_vm1, %v5582_v24, -inf }
 0x24c   : > { %6414 = vst [vmem:[#allocation54_spill] sm:$0xff] %v5588_v31  ;;  %1494 = vmax.xlane.f32.xlu1 %v1493_v50  ;;  %v1490_v28 = vsel %vm581_vm1, %v5588_v31, -inf  ;;  %v5598_v38 = vpop.trf.xlu0 }
 0x24d   : > { %1491 = vmax.xlane.f32.xlu0 %v1490_v28  ;;  %6417 = vst [vmem:[#allocation57_spill] sm:$0xff] %v5598_v38  ;;  %v5600_v9 = vpop.trf.xlu1 }
 0x24e   : > { %6418 = vst [vmem:[#allocation58_spill] sm:$0xff] %v5600_v9 }
 0x250   : > { %v5602_v47 = vpop.trf.xlu0 }
 0x251   : > { %6419 = vst [vmem:[#allocation59_spill] sm:$0xff] %v5602_v47  ;;  %v5604_v11 = vpop.trf.xlu1 }
 0x252   : > { %6420 = vst [vmem:[#allocation60_spill] sm:$0xff] %v5604_v11 }
 0x254   : > { %v5606_v22 = vpop.trf.xlu0 }
 0x255   : > { %6421 = vst [vmem:[#allocation61_spill] sm:$0xff] %v5606_v22  ;;  %v5608_v24 = vpop.trf.xlu1 }
 0x256   : > { %6422 = vst [vmem:[#allocation62_spill] sm:$0xff] %v5608_v24 }
 0x264   : > { %v1405_v50 = vpop.xlane.xlu0 %1404 }
 0x265   : > { %v1497_v31 = vsub.f32 %v5326_v17, %v1405_v50 }
 0x267   : > { %v1530_v13 = vmul.f32 1.442695, %v1497_v31 }
 0x268   : > { %v1411_v51 = vpop.xlane.xlu1 %1410  ;;  %v1402_v28 = vpop.xlane.xlu0 %1401 }
 0x269   : > { %4812 = vpow2.f32 %v1530_v13  ;;  %v1499_v53 = vsub.f32 %v5338_v23, %v1411_v51  ;;  %v1496_v38 = vsub.f32 %v5332_v39, %v1402_v28 }
 0x26b   : > { %v1534_v9 = vmul.f32 1.442695, %v1499_v53  ;;  %v1528_v6 = vmul.f32 1.442695, %v1496_v38 }
 0x26c   : > { %v1408_v47 = vpop.xlane.xlu0 %1407 }
 0x26d   : > { %4814 = vpow2.f32 %v1534_v9  ;;  %v1498_v11 = vsub.f32 %v5348_v30, %v1408_v47 }
 0x26e   : > { %4816 = vpow2.f32 %v1528_v6 }
 0x26f   : > { %v1532_v22 = vmul.f32 1.442695, %v1498_v11 }
 0x271   : > { %4818 = vpow2.f32 %v1532_v22 }
 0x273   : > { %v5614_v24 = vpop.eup %4812 }
 0x274   : > { %v1595_v17 = vsel %vm581_vm1, %v5614_v24, 0.0 }
 0x275   : > { %v1417_v31 = vpop.xlane.xlu1 %1416  ;;  %1596 = vadd.xlane.f32.xlu1 %v1595_v17 }
 0x276   : > { %v1501_v23 = vsub.f32 %v5360_v41, %v1417_v31 }
 0x277   : > { %v5619_v13 = vpop.eup %4814 }
 0x278   : > { %v5621_v39 = vpop.eup %4816  ;;  %v1538_v51 = vmul.f32 1.442695, %v1501_v23  ;;  %v1601_v9 = vsel %vm581_vm1, %v5619_v13, 0.0 }
 0x279   : > { %v1414_v6 = vpop.xlane.xlu1 %1413  ;;  %1602 = vadd.xlane.f32.xlu1 %v1601_v9  ;;  %v1592_v30 = vsel %vm581_vm1, %v5621_v39, 0.0 }
 0x27a   : > { %4820 = vpow2.f32 %v1538_v51  ;;  %v1500_v47 = vsub.f32 %v5368_v48, %v1414_v6  ;;  %1593 = vadd.xlane.f32.xlu0 %v1592_v30  ;;  %v1420_v53 = vpop.xlane.xlu0 %1419 }
 0x27b   : > { %v5628_v38 = vpop.eup %4818  ;;  %v1502_v41 = vsub.f32 %v5374_v57, %v1420_v53 }
 0x27c   : > { %v1536_v11 = vmul.f32 1.442695, %v1500_v47  ;;  %v1598_v22 = vsel %vm581_vm1, %v5628_v38, 0.0 }
 0x27d   : > { %v1540_v50 = vmul.f32 1.442695, %v1502_v41  ;;  %v1423_v28 = vpop.xlane.xlu1 %1422 }
 0x27e   : > { %4822 = vpow2.f32 %v1536_v11  ;;  %v1503_v17 = vsub.f32 %v5380_v59, %v1423_v28  ;;  %1599 = vadd.xlane.f32.xlu0 %v1598_v22 }
 0x27f   : > { %4824 = vpow2.f32 %v1540_v50 }
 0x280   : > { %v1542_v31 = vmul.f32 1.442695, %v1503_v17 }
 0x282   : > { %4826 = vpow2.f32 %v1542_v31 }
 0x284   : > { %v5634_v48 = vpop.eup %4820 }
 0x285   : > { %v1429_v23 = vpop.xlane.xlu1 %1428  ;;  %v1607_v51 = vsel %vm581_vm1, %v5634_v48, 0.0 }
 0x286   : > { %v1505_v57 = vsub.f32 %v5394_v26, %v1429_v23  ;;  %1608 = vadd.xlane.f32.xlu1 %v1607_v51  ;;  %v1426_v9 = vpop.xlane.xlu0 %1425 }
 0x287   : > { %v1504_v6 = vsub.f32 %v5400_v37, %v1426_v9 }
 0x288   : > { %v5640_v30 = vpop.eup %4822  ;;  %v1546_v47 = vmul.f32 1.442695, %v1505_v57 }
 0x289   : > { %v1544_v59 = vmul.f32 1.442695, %v1504_v6  ;;  %v1435_v53 = vpop.xlane.xlu1 %1434  ;;  %v1604_v41 = vsel %vm581_vm1, %v5640_v30, 0.0  ;;  %v5644_v11 = vpop.eup %4824 }
 0x28a   : > { %4828 = vpow2.f32 %v1546_v47  ;;  %v1507_v22 = vsub.f32 %v5410_v58, %v1435_v53  ;;  %1605 = vadd.xlane.f32.xlu0 %v1604_v41  ;;  %v1432_v50 = vpop.xlane.xlu0 %1431  ;;  %v1610_v23 = vsel %vm581_vm1, %v5644_v11, 0.0 }
 0x28b   : > { %4830 = vpow2.f32 %v1544_v59  ;;  %v1506_v26 = vsub.f32 %v5414_v18, %v1432_v50 }
 0x28c   : > { %v5648_v28 = vpop.eup %4826  ;;  %v1550_v37 = vmul.f32 1.442695, %v1507_v22 }
 0x28d   : > { %v1548_v17 = vmul.f32 1.442695, %v1506_v26  ;;  %v1613_v31 = vsel %vm581_vm1, %v5648_v28, 0.0 }
 0x28e   : > { %4832 = vpow2.f32 %v1550_v37  ;;  %1614 = vadd.xlane.f32.xlu1 %v1613_v31  ;;  %1611 = vadd.xlane.f32.xlu0 %v1610_v23 }
 0x28f   : > { %4834 = vpow2.f32 %v1548_v17 }
 0x294   : > { %v5654_v58 = vpop.eup %4828 }
 0x295   : > { %v5656_v51 = vpop.eup %4830  ;;  %v1441_v57 = vpop.xlane.xlu1 %1440  ;;  %v1619_v18 = vsel %vm581_vm1, %v5654_v58, 0.0 }
 0x296   : > { %v1509_v9 = vsub.f32 %v5430_v45, %v1441_v57  ;;  %1620 = vadd.xlane.f32.xlu1 %v1619_v18  ;;  %v1438_v6 = vpop.xlane.xlu0 %1437  ;;  %v1616_v47 = vsel %vm581_vm1, %v5656_v51, 0.0 }
 0x297   : > { %v1508_v59 = vsub.f32 %v5434_v25, %v1438_v6  ;;  %1617 = vadd.xlane.f32.xlu0 %v1616_v47 }
 0x298   : > { %v5664_v53 = vpop.eup %4832  ;;  %v1554_v41 = vmul.f32 1.442695, %v1509_v9 }
 0x299   : > { %v5666_v22 = vpop.eup %4834  ;;  %v1552_v50 = vmul.f32 1.442695, %v1508_v59  ;;  %v1447_v26 = vpop.xlane.xlu1 %1446  ;;  %v1625_v37 = vsel %vm581_vm1, %v5664_v53, 0.0 }
 0x29a   : > { %4836 = vpow2.f32 %v1554_v41  ;;  %v1511_v45 = vsub.f32 %v5444_v49, %v1447_v26  ;;  %1626 = vadd.xlane.f32.xlu1 %v1625_v37  ;;  %v1444_v17 = vpop.xlane.xlu0 %1443  ;;  %v1622_v31 = vsel %vm581_vm1, %v5666_v22, 0.0 }
 0x29b   : > { %4838 = vpow2.f32 %v1552_v50  ;;  %v1510_v25 = vsub.f32 %v5450_v34, %v1444_v17  ;;  %1623 = vadd.xlane.f32.xlu0 %v1622_v31 }
 0x29c   : > { %v1558_v23 = vmul.f32 1.442695, %v1511_v45 }
 0x29d   : > { %v1556_v57 = vmul.f32 1.442695, %v1510_v25 }
 0x29e   : > { %4840 = vpow2.f32 %v1558_v23 }
 0x29f   : > { %4842 = vpow2.f32 %v1556_v57 }
 0x2a4   : > { %v5674_v18 = vpop.eup %4836 }
 0x2a5   : > { %v5676_v9 = vpop.eup %4838  ;;  %v1453_v6 = vpop.xlane.xlu1 %1452  ;;  %v1631_v49 = vsel %vm581_vm1, %v5674_v18, 0.0 }
 0x2a6   : > { %v1513_v47 = vsub.f32 %v5464_v32, %v1453_v6  ;;  %1632 = vadd.xlane.f32.xlu1 %v1631_v49  ;;  %v1450_v59 = vpop.xlane.xlu0 %1449  ;;  %v1628_v34 = vsel %vm581_vm1, %v5676_v9, 0.0 }
 0x2a7   : > { %v1512_v41 = vsub.f32 %v5470_v43, %v1450_v59  ;;  %1629 = vadd.xlane.f32.xlu0 %v1628_v34 }
 0x2a8   : > { %v5684_v50 = vpop.eup %4840  ;;  %v1562_v26 = vmul.f32 1.442695, %v1513_v47 }
 0x2a9   : > { %v5686_v37 = vpop.eup %4842  ;;  %v1560_v45 = vmul.f32 1.442695, %v1512_v41  ;;  %v1459_v17 = vpop.xlane.xlu1 %1458  ;;  %v1637_v31 = vsel %vm581_vm1, %v5684_v50, 0.0 }
 0x2aa   : > { %4844 = vpow2.f32 %v1562_v26  ;;  %v1515_v32 = vsub.f32 %v5478_v42, %v1459_v17  ;;  %1638 = vadd.xlane.f32.xlu1 %v1637_v31  ;;  %v1456_v25 = vpop.xlane.xlu0 %1455  ;;  %v1634_v23 = vsel %vm581_vm1, %v5686_v37, 0.0 }
 0x2ab   : > { %4846 = vpow2.f32 %v1560_v45  ;;  %v1514_v43 = vsub.f32 %v5484_v27, %v1456_v25  ;;  %1635 = vadd.xlane.f32.xlu0 %v1634_v23 }
 0x2ac   : > { %v1566_v57 = vmul.f32 1.442695, %v1515_v32 }
 0x2ad   : > { %v1564_v6 = vmul.f32 1.442695, %v1514_v43 }
 0x2ae   : > { %4848 = vpow2.f32 %v1566_v57 }
 0x2af   : > { %4850 = vpow2.f32 %v1564_v6 }
 0x2b4   : > { %v5694_v49 = vpop.eup %4844 }
 0x2b5   : > { %v5696_v47 = vpop.eup %4846  ;;  %v1465_v59 = vpop.xlane.xlu1 %1464  ;;  %v1643_v42 = vsel %vm581_vm1, %v5694_v49, 0.0 }
 0x2b6   : > { %v1517_v34 = vsub.f32 %v5498_v36, %v1465_v59  ;;  %1644 = vadd.xlane.f32.xlu1 %v1643_v42  ;;  %v1462_v41 = vpop.xlane.xlu0 %1461  ;;  %v1640_v27 = vsel %vm581_vm1, %v5696_v47, 0.0 }
 0x2b7   : > { %v1516_v26 = vsub.f32 %v5504_v20, %v1462_v41  ;;  %1641 = vadd.xlane.f32.xlu0 %v1640_v27 }
 0x2b8   : > { %v5704_v45 = vpop.eup %4848  ;;  %v1570_v17 = vmul.f32 1.442695, %v1517_v34 }
 0x2b9   : > { %v5706_v31 = vpop.eup %4850  ;;  %v1568_v32 = vmul.f32 1.442695, %v1516_v26  ;;  %v1471_v25 = vpop.xlane.xlu1 %1470  ;;  %v1649_v23 = vsel %vm581_vm1, %v5704_v45, 0.0 }
 0x2ba   : > { %4852 = vpow2.f32 %v1570_v17  ;;  %v1519_v36 = vsub.f32 %v5514_v33, %v1471_v25  ;;  %1650 = vadd.xlane.f32.xlu1 %v1649_v23  ;;  %v1468_v43 = vpop.xlane.xlu0 %1467  ;;  %v1646_v57 = vsel %vm581_vm1, %v5706_v31, 0.0 }
 0x2bb   : > { %4854 = vpow2.f32 %v1568_v32  ;;  %v1518_v20 = vsub.f32 %v5518_v55, %v1468_v43  ;;  %1647 = vadd.xlane.f32.xlu0 %v1646_v57 }
 0x2bc   : > { %v1574_v6 = vmul.f32 1.442695, %v1519_v36  ;;  %v487_v36 = vadd.f32 %v5178_v52, %v5102_v44  ;;  %v517_v52 = vadd.f32 %v5213_v10, %v5102_v44 }
 0x2bd   : > { %v1572_v59 = vmul.f32 1.442695, %v1518_v20  ;;  %v493_v20 = vadd.f32 %v5185_v56, %v5102_v44  ;;  %v505_v56 = vadd.f32 %v5199_v1, %v5102_v44 }
 0x2be   : > { %4856 = vpow2.f32 %v1574_v6  ;;  %v511_v6 = vadd.f32 %v5206_v7, %v5102_v44  ;;  %v523_v7 = vadd.f32 %v5218_v16, %v5102_v44 }
 0x2bf   : > { %4858 = vpow2.f32 %v1572_v59 }
 0x2c4   : > { %v5714_v42 = vpop.eup %4852 }
 0x2c5   : > { %v5716_v34 = vpop.eup %4854  ;;  %v1655_v33 = vsel %vm581_vm1, %v5714_v42, 0.0  ;;  %v5730_v32 = vpop.xlane.xlu1 %1476 }
 0x2c6   : > { %1656 = vadd.xlane.f32.xlu1 %v1655_v33  ;;  %v1652_v41 = vsel %vm581_vm1, %v5716_v34, 0.0  ;;  %v5732_v25 = vpop.xlane.xlu0 %1473  ;;  %v499_v33 = vadd.f32 %v5190_v62, %v5102_v44  ;;  %v529_v62 = vadd.f32 %v5227_v19, %v5102_v44 }
 0x2c7   : > { %1653 = vadd.xlane.f32.xlu0 %v1652_v41 }
 0x2c8   : > { %v5722_v27 = vpop.eup %4856 }
 0x2c9   : > { %v5724_v55 = vpop.eup %4858  ;;  %v1661_v26 = vsel %vm581_vm1, %v5722_v27, 0.0  ;;  %v5734_v23 = vpop.xlane.xlu1 %1482 }
 0x2ca   : > { %1662 = vadd.xlane.f32.xlu1 %v1661_v26  ;;  %v1658_v17 = vsel %vm581_vm1, %v5724_v55, 0.0  ;;  %v5740_v57 = vpop.xlane.xlu0 %1479 }
 0x2cb   : > { %1659 = vadd.xlane.f32.xlu0 %v1658_v17 }
 0x2d5   : > { %v5738_v43 = vpop.xlane.xlu1 %1488 }
 0x2d6   : > { %v5746_v59 = vpop.xlane.xlu0 %1485 }
 0x2d9   : > { %v5750_v41 = vpop.xlane.xlu1 %1494 }
 0x2da   : > { %v5758_v17 = vpop.xlane.xlu0 %1491 }
 0x2f8   : > { %2696 = vxpose.xlu0.b32.start [1/4] (short) %v487_v36, 128 }
 0x2fc   : > { %2697 = vxpose.xlu0.b32.cont [2/4] (short) %v493_v20, 128 }
 0x2fd   : > { %2921 = vxpose.xlu1.b32.start [1/4] (short) %v511_v6, 128  ;;  %v1364_v6 = vadd.s32 24, %v5095_v40 }
 0x2ff   : > { %vm1755_vm4 = vcmp.lt.s32.totalorder %v1364_v6, 25 }
 0x300   : > { %2698 = vxpose.xlu0.b32.cont [3/4] (short) %v499_v33, 128  ;;  %vm5767_vm6 = vmpackc.low %vm1755_vm4, %vm4949_vm5 }
 0x301   : > { %2922 = vxpose.xlu1.b32.cont [2/4] (short) %v517_v52, 128 }
 0x302   : > { %v1597_v26 = vpop.xlane.xlu1 %1596 }
 0x303   : > { %4860 = vrcp.f32 %v1597_v26 }
 0x304   : > { %2699 = vxpose.xlu0.b32.end [4/4] (short) %v505_v56, 128 }
 0x305   : > { %2923 = vxpose.xlu1.b32.cont [3/4] (short) %v523_v7, 128 }
 0x306   : > { %v1603_v36 = vpop.xlane.xlu1 %1602 }
 0x307   : > { %v1594_v20 = vpop.xlane.xlu0 %1593 }
 0x308   : > { %4862 = vrcp.f32 %v1594_v20 }
 0x309   : > { %2924 = vxpose.xlu1.b32.end [4/4] (short) %v529_v62, 128  ;;  %4864 = vrcp.f32 %v1603_v36 }
 0x30b   : > { %v1600_v10 = vpop.xlane.xlu0 %1599 }
 0x30c   : > { %4866 = vrcp.f32 %v1600_v10 }
 0x30d   : > { %v4861_v1 = vpop.eup %4860 }
 0x30e   : > { %v1721_v56 = vmul.f32 %v4861_v1, %v5614_v24 }
 0x312   : > { %v4863_v33 = vpop.eup %4862 }
 0x313   : > { %v1609_v16 = vpop.xlane.xlu1 %1608  ;;  %v1720_v52 = vmul.f32 %v4863_v33, %v5621_v39  ;;  %v4865_v26 = vpop.eup %4864 }
 0x314   : > { %4868 = vrcp.f32 %v1609_v16  ;;  %v1723_v36 = vmul.f32 %v4865_v26, %v5619_v13 }
 0x315   : > { %v4722_v7 = vpack.c.bf16 %v1721_v56, %v1720_v52 }
 0x316   : > { %v4867_v19 = vpop.eup %4866 }
 0x317   : > { %4723 = vmatprep.subr.bf16.mxu0 %v4722_v7  ;;  %v1606_v20 = vpop.xlane.xlu0 %1605  ;;  %v1722_v62 = vmul.f32 %v4867_v19, %v5628_v38 }
 0x318   : > { %4870 = vrcp.f32 %v1606_v20  ;;  %4725 = vmatpush3.bf16.msra.mxu0 %v4722_v7 }
 0x319   : > { %v4726_v39 = vpack.c.bf16 %v1723_v36, %v1722_v62  ;;  %v6432_v62 = vld [vmem:[#allocation25_spill] sm:$0xff] }
 0x31b   : > { %v1615_v24 = vpop.xlane.xlu1 %1614  ;;  %4728 = vmatprep.subr.msk.bf16.mxu0 %vm5767_vm6, %v4726_v39  ;;  %v1612_v10 = vpop.xlane.xlu0 %1611 }
 0x31c   : > { %4872 = vrcp.f32 %v1615_v24  ;;  %4731 = vmatpush3.bf16.msk.msra.mxu0 %vm5767_vm6, %v4726_v39  ;;  %v6433_v39 = vld [vmem:[#allocation14_spill] sm:$0xff]  ;;  %v6434_v24 = vld [vmem:[#allocation27_spill] sm:$0xff] }
 0x31d   : > { %4874 = vrcp.f32 %v1612_v10 }
 0x31e   : > { %v4869_v13 = vpop.eup %4868 }
 0x31f   : > { %4375 = vmatmul.mubr.msk.f32.vlgmr.msra.gmra.mrb[64].mxu0 %vm581_vm1, %v5290_v60  ;;  %v1725_v33 = vmul.f32 %v4869_v13, %v5634_v48  ;;  %v6435_v13 = vld [vmem:[#allocation15_spill] sm:$0xff] }
 0x320   : > { %4377 = vmatprep.mubr.msk.f32.mxu0 %vm581_vm1, %v5294_v63 }
 0x322   : > { %v4871_v38 = vpop.eup %4870 }
 0x323   : > { %v1621_v1 = vpop.xlane.xlu1 %1620  ;;  %4378 = vmatmul.mubr.msk.f32.gmra.mrb[66].mxu0 %vm581_vm1, %v5298_v54  ;;  %v1724_v6 = vmul.f32 %v4871_v38, %v5640_v30 }
 0x324   : > { %4876 = vrcp.f32 %v1621_v1  ;;  %4380 = vmatprep.mubr.msk.f32.mxu0 %vm581_vm1, %v5302_v3  ;;  %v1618_v16 = vpop.xlane.xlu0 %1617 }
 0x325   : > { %4878 = vrcp.f32 %v1618_v16  ;;  %v4732_v60 = vpack.c.bf16 %v1725_v33, %v1724_v6  ;;  %v6436_v16 = vld [vmem:[#allocation29_spill] sm:$0xff] }
 0x326   : > { %v4873_v52 = vpop.eup %4872 }
 0x327   : > { %v4875_v56 = vpop.eup %4874  ;;  %v1627_v26 = vpop.xlane.xlu1 %1626  ;;  %4381 = vmatmul.mubr.msk.f32.gmra.mrb[68].mxu0 %vm581_vm1, %v5306_v5  ;;  %4733 = vmatprep.subr.bf16.mxu1 %v4732_v60  ;;  %v1727_v63 = vmul.f32 %v4873_v52, %v5648_v28  ;;  %v6438_v52 = vld [vmem:[#allocation31_spill] sm:$0xff] }
 0x328   : > { %4880 = vrcp.f32 %v1627_v26  ;;  %4383 = vmatprep.mubr.msk.f32.mxu0 %vm581_vm1, %v5310_v8  ;;  %4735 = vmatpush3.bf16.msra.mxu1 %v4732_v60  ;;  %v1624_v54 = vpop.xlane.xlu0 %1623  ;;  %v1726_v3 = vmul.f32 %v4875_v56, %v5644_v11  ;;  %v6437_v60 = vld [vmem:[#allocation16_spill] sm:$0xff]  ;;  %v6439_v26 = vld [vmem:[#allocation17_spill] sm:$0xff] }
 0x329   : > { %4882 = vrcp.f32 %v1624_v54 }
 0x32a   : > { %v4736_v48 = vpack.c.bf16 %v1727_v63, %v1726_v3  ;;  %v6440_v3 = vld [vmem:[#allocation33_spill] sm:$0xff] }
 0x32b   : > { %4384 = vmatmul.mubr.msk.f32.gmra.mrb[70].mxu0 %vm581_vm1, %v5317_v12 }
 0x32c   : > { %4738 = vmatprep.subr.msk.bf16.mxu1 %vm5767_vm6, %v4736_v48  ;;  %4386 = vmatprep.mubr.msk.f32.mxu0 %vm581_vm1, %v5322_v15 }
 0x32d   : > { %4741 = vmatpush3.bf16.msk.msra.mxu1 %vm5767_vm6, %v4736_v48  ;;  %v6442_v48 = vld [vmem:[#allocation35_spill] sm:$0xff] }
 0x32e   : > { %v4877_v5 = vpop.eup %4876 }
 0x32f   : > { %v4879_v8 = vpop.eup %4878  ;;  %4387 = vmatmul.mubr.msk.f32.gmra.mrb[72].mxu0 %vm581_vm1, %v5344_v29  ;;  %v1729_v30 = vmul.f32 %v4877_v5, %v5654_v58  ;;  %v6425_v58 = vld [vmem:[#allocation10_spill] sm:$0xff] }
 0x330   : > { %4407 = vmatmul.mubr.msk.f32.vlgmr.msra.gmra.mrb[32].mxu1 %vm581_vm1, %v5292_v61  ;;  %4389 = vmatprep.mubr.msk.f32.mxu0 %vm581_vm1, %v5354_v35  ;;  %v1728_v12 = vmul.f32 %v4879_v8, %v5656_v51  ;;  %v6427_v51 = vld [vmem:[#allocation11_spill] sm:$0xff]  ;;  %v6444_v8 = vld [vmem:[#allocation40_spill] sm:$0xff] }
 0x331   : > { %4409 = vmatprep.mubr.msk.f32.mxu1 %vm581_vm1, %v5296_v0 }
 0x332   : > { %v4881_v15 = vpop.eup %4880  ;;  %v4742_v11 = vpack.c.bf16 %v1729_v30, %v1728_v12  ;;  %v1521_v30 = vsub.f32 %v6444_v8, %v5730_v32  ;;  %v6445_v12 = vld [vmem:[#allocation41_spill] sm:$0xff]  ;;  %v6470_v8 = vld [vmem:[#allocation42_spill] sm:$0xff] }
 0x333   : > { %v4883_v28 = vpop.eup %4882  ;;  %v1633_v7 = vpop.xlane.xlu1 %1632  ;;  %4390 = vmatmul.mubr.msk.f32.gmra.mrb[74].mxu0 %vm581_vm1, %v5362_v46  ;;  %v1731_v29 = vmul.f32 %v4881_v15, %v5664_v53  ;;  %v6430_v53 = vld [vmem:[#allocation23_spill] sm:$0xff]  ;;  %v1520_v15 = vsub.f32 %v6445_v12, %v5732_v25  ;;  %v6451_v25 = vld [vmem:[#allocation45_spill] sm:$0xff] }
 0x334   : > { %4884 = vrcp.f32 %v1633_v7  ;;  %4410 = vmatmul.mubr.msk.f32.gmra.mrb[34].mxu1 %vm581_vm1, %v5300_v2  ;;  %4392 = vmatprep.mubr.msk.f32.mxu0 %vm581_vm1, %v5384_v14  ;;  %v1630_v61 = vpop.xlane.xlu0 %1629  ;;  %v1730_v35 = vmul.f32 %v4883_v28, %v5666_v22  ;;  %v6426_v2 = vld [vmem:[#allocation19_spill] sm:$0xff]  ;;  %v6431_v22 = vld [vmem:[#allocation13_spill] sm:$0xff]  ;;  %v6447_v28 = vld [vmem:[#allocation22_spill] sm:$0xff]  ;;  %v1578_v32 = vmul.f32 1.442695, %v1521_v30 }
 0x335   : > { %4412 = vmatprep.mubr.msk.f32.mxu1 %vm581_vm1, %v5304_v4  ;;  %4743 = vmatprep.subr.bf16.mxu0 %v4742_v11  ;;  %4886 = vrcp.f32 %v1630_v61  ;;  %v6428_v4 = vld [vmem:[#allocation21_spill] sm:$0xff]  ;;  %v6448_v7 = vld [vmem:[#allocation39_spill] sm:$0xff] }
 0x336   : > { %4745 = vmatpush3.bf16.msra.mxu0 %v4742_v11  ;;  %v4746_v0 = vpack.c.bf16 %v1731_v29, %v1730_v35  ;;  %v6446_v11 = vld [vmem:[#allocation37_spill] sm:$0xff]  ;;  %v6449_v29 = vld [vmem:[#allocation24_spill] sm:$0xff]  ;;  %v6450_v35 = vld [vmem:[#allocation43_spill] sm:$0xff] }
 0x337   : > { %v1639_v46 = vpop.xlane.xlu1 %1638  ;;  %4393 = vmatmul.mubr.msk.f32.gmra.mrb[76].mxu0 %vm581_vm1, %v5390_v21  ;;  %v6429_v21 = vld [vmem:[#allocation12_spill] sm:$0xff] }
 0x338   : > { %4888 = vrcp.f32 %v1639_v46  ;;  %4413 = vmatmul.mubr.msk.f32.gmra.mrb[36].mxu1 %vm581_vm1, %v6425_v58  ;;  %4395 = vmatprep.mubr.msk.f32.mxu0 %vm581_vm1, %v6426_v2  ;;  %v1636_v14 = vpop.xlane.xlu0 %1635  ;;  %v1576_v58 = vmul.f32 1.442695, %v1520_v15  ;;  %v1522_v2 = vsub.f32 %v6451_v25, %v5740_v57  ;;  %v6456_v57 = vld [vmem:[#allocation49_spill] sm:$0xff] }
 0x339   : > { %4415 = vmatprep.mubr.msk.f32.mxu1 %vm581_vm1, %v6427_v51  ;;  %4748 = vmatprep.subr.msk.bf16.mxu0 %vm5767_vm6, %v4746_v0  ;;  %4890 = vrcp.f32 %v1636_v14  ;;  %v6452_v14 = vld [vmem:[#allocation44_spill] sm:$0xff] }
 0x33a   : > { %4751 = vmatpush3.bf16.msk.msra.mxu0 %vm5767_vm6, %v4746_v0  ;;  %v1523_v0 = vsub.f32 %v6450_v35, %v5734_v23  ;;  %v6472_v35 = vld [vmem:[#allocation48_spill] sm:$0xff] }
 0x33b   : > { %4396 = vmatmul.mubr.msk.f32.gmra.mrb[78].mxu0 %vm581_vm1, %v6428_v4  ;;  %v6453_v4 = vld [vmem:[#allocation26_spill] sm:$0xff] }
 0x33c   : > { %4416 = vmatmul.mubr.msk.f32.gmra.mrb[38].mxu1 %vm581_vm1, %v6429_v21  ;;  %4438 = vmatprep.mubr.msk.f32.mxu0 %vm581_vm1, %v6430_v53  ;;  %v6454_v21 = vld [vmem:[#allocation47_spill] sm:$0xff] }
 0x33d   : > { %4418 = vmatprep.mubr.msk.f32.mxu1 %vm581_vm1, %v6431_v22  ;;  %v6455_v22 = vld [vmem:[#allocation28_spill] sm:$0xff] }
 0x33e   : > { %v4885_v19 = vpop.eup %4884 }
 0x33f   : > { %v4887_v20 = vpop.eup %4886  ;;  %4439 = vmatmul.mubr.msk.f32.vlgmr.msra.gmra.mrb[80].mxu0 %vm581_vm1, %v6432_v62  ;;  %v1733_v36 = vmul.f32 %v4885_v19, %v5674_v18  ;;  %v1582_v19 = vmul.f32 1.442695, %v1523_v0 }
 0x340   : > { %4419 = vmatmul.mubr.msk.f32.gmra.mrb[40].mxu1 %vm581_vm1, %v6433_v39  ;;  %4441 = vmatprep.mubr.msk.f32.mxu0 %vm581_vm1, %v6434_v24  ;;  %v1732_v10 = vmul.f32 %v4887_v20, %v5676_v9  ;;  %v1525_v20 = vsub.f32 %v6456_v57, %v5738_v43  ;;  %v6457_v24 = vld [vmem:[#allocation50_spill] sm:$0xff] }
 0x341   : > { %4421 = vmatprep.mubr.msk.f32.mxu1 %vm581_vm1, %v6435_v13 }
 0x342   : > { %v4889_v38 = vpop.eup %4888  ;;  %v4752_v1 = vpack.c.bf16 %v1733_v36, %v1732_v10 }
 0x343   : > { %v4891_v6 = vpop.eup %4890  ;;  %v1645_v33 = vpop.xlane.xlu1 %1644  ;;  %4442 = vmatmul.mubr.msk.f32.gmra.mrb[82].mxu0 %vm581_vm1, %v6436_v16  ;;  %v1735_v18 = vmul.f32 %v4889_v38, %v5684_v50  ;;  %v6441_v50 = vld [vmem:[#allocation18_spill] sm:$0xff]  ;;  %v6462_v16 = vld [vmem:[#allocation52_spill] sm:$0xff] }
 0x344   : > { %4892 = vrcp.f32 %v1645_v33  ;;  %4422 = vmatmul.mubr.msk.f32.gmra.mrb[42].mxu1 %vm581_vm1, %v6437_v60  ;;  %4444 = vmatprep.mubr.msk.f32.mxu0 %vm581_vm1, %v6438_v52  ;;  %v1642_v9 = vpop.xlane.xlu0 %1641  ;;  %v1734_v56 = vmul.f32 %v4891_v6, %v5686_v37  ;;  %v6443_v37 = vld [vmem:[#allocation20_spill] sm:$0xff]  ;;  %v6459_v38 = vld [vmem:[#allocation30_spill] sm:$0xff]  ;;  %v6463_v52 = vld [vmem:[#allocation57_spill] sm:$0xff] }
 0x345   : > { %4424 = vmatprep.mubr.msk.f32.mxu1 %vm581_vm1, %v6439_v26  ;;  %4753 = vmatprep.subr.bf16.mxu1 %v4752_v1  ;;  %4894 = vrcp.f32 %v1642_v9  ;;  %v6461_v33 = vld [vmem:[#allocation32_spill] sm:$0xff]  ;;  %v6465_v26 = vld [vmem:[#allocation34_spill] sm:$0xff] }
 0x346   : > { %4755 = vmatpush3.bf16.msra.mxu1 %v4752_v1  ;;  %v4756_v63 = vpack.c.bf16 %v1735_v18, %v1734_v56  ;;  %v6460_v1 = vld [vmem:[#allocation55_spill] sm:$0xff] }
 0x347   : > { %v1651_v54 = vpop.xlane.xlu1 %1650  ;;  %4445 = vmatmul.mubr.msk.f32.gmra.mrb[84].mxu0 %vm581_vm1, %v6440_v3 }
 0x348   : > { %4896 = vrcp.f32 %v1651_v54  ;;  %4425 = vmatmul.mubr.msk.f32.gmra.mrb[44].mxu1 %vm581_vm1, %v6441_v50  ;;  %4447 = vmatprep.mubr.msk.f32.mxu0 %vm581_vm1, %v6442_v48  ;;  %v1648_v5 = vpop.xlane.xlu0 %1647 }
 0x349   : > { %4427 = vmatprep.mubr.msk.f32.mxu1 %vm581_vm1, %v6443_v37  ;;  %4758 = vmatprep.subr.msk.bf16.mxu1 %vm5767_vm6, %v4756_v63  ;;  %4898 = vrcp.f32 %v1648_v5  ;;  %v6469_v5 = vld [vmem:[#allocation38_spill] sm:$0xff] }
 0x34a   : > { %4761 = vmatpush3.bf16.msk.msra.mxu1 %vm5767_vm6, %v4756_v63  ;;  %4900 = vpow2.f32 %v1578_v32  ;;  %v6466_v63 = vld [vmem:[#allocation59_spill] sm:$0xff] }
 0x34b   : > { %4448 = vmatmul.mubr.msk.f32.gmra.mrb[86].mxu0 %vm581_vm1, %v6446_v11  ;;  %4902 = vpow2.f32 %v1576_v58 }
 0x34c   : > { %4428 = vmatmul.mubr.msk.f32.gmra.mrb[46].mxu1 %vm581_vm1, %v6447_v28  ;;  %4450 = vmatprep.mubr.msk.f32.mxu0 %vm581_vm1, %v6448_v7  ;;  %v6471_v7 = vld [vmem:[#allocation46_spill] sm:$0xff] }
 0x34d   : > { %4470 = vmatprep.mubr.msk.f32.mxu1 %vm581_vm1, %v6449_v29 }
 0x34e   : > { %v4893_v61 = vpop.eup %4892 }
 0x34f   : > { %v4895_v46 = vpop.eup %4894  ;;  %4451 = vmatmul.mubr.msk.f32.gmra.mrb[88].mxu0 %vm581_vm1, %v6452_v14  ;;  %v1737_v51 = vmul.f32 %v4893_v61, %v5694_v49  ;;  %v1580_v49 = vmul.f32 1.442695, %v1522_v2  ;;  %v6473_v14 = vld [vmem:[#allocation53_spill] sm:$0xff] }
 0x350   : > { %4471 = vmatmul.mubr.msk.f32.vlgmr.msra.gmra.mrb[48].mxu1 %vm581_vm1, %v6453_v4  ;;  %4453 = vmatprep.mubr.msk.f32.mxu0 %vm581_vm1, %v6454_v21  ;;  %v1736_v53 = vmul.f32 %v4895_v46, %v5696_v47  ;;  %v6458_v47 = vld [vmem:[#allocation51_spill] sm:$0xff] }
 0x351   : > { %4473 = vmatprep.mubr.msk.f32.mxu1 %vm581_vm1, %v6455_v22  ;;  %v1524_v13 = vsub.f32 %v6458_v47, %v5746_v59  ;;  %v1527_v59 = vsub.f32 %v6462_v16, %v5750_v41  ;;  %v6467_v41 = vld [vmem:[#allocation36_spill] sm:$0xff] }
 0x352   : > { %v4897_v23 = vpop.eup %4896  ;;  %v4762_v62 = vpack.c.bf16 %v1737_v51, %v1736_v53  ;;  %v6474_v51 = vld [vmem:[#allocation56_spill] sm:$0xff] }
 0x353   : > { %v4899_v36 = vpop.eup %4898  ;;  %v1657_v39 = vpop.xlane.xlu1 %1656  ;;  %4454 = vmatmul.mubr.msk.f32.gmra.mrb[90].mxu0 %vm581_vm1, %v6457_v24  ;;  %v1739_v10 = vmul.f32 %v4897_v23, %v5704_v45  ;;  %v1586_v45 = vmul.f32 1.442695, %v1525_v20  ;;  %v1584_v9 = vmul.f32 1.442695, %v1524_v13  ;;  %v1590_v3 = vmul.f32 1.442695, %v1527_v59 }
 0x354   : > { %4904 = vrcp.f32 %v1657_v39  ;;  %4474 = vmatmul.mubr.msk.f32.gmra.mrb[50].mxu1 %vm581_vm1, %v6459_v38  ;;  %4456 = vmatprep.mubr.msk.f32.mxu0 %vm581_vm1, %v6460_v1  ;;  %v1654_v43 = vpop.xlane.xlu0 %1653  ;;  %v1738_v6 = vmul.f32 %v4899_v36, %v5706_v31  ;;  %v6464_v31 = vld [vmem:[#allocation54_spill] sm:$0xff]  ;;  %v5929_v50 = vpop.eup %4900 }
 0x355   : > { %4476 = vmatprep.mubr.msk.f32.mxu1 %vm581_vm1, %v6461_v33  ;;  %4763 = vmatprep.subr.bf16.mxu0 %v4762_v62  ;;  %4906 = vrcp.f32 %v1654_v43  ;;  %v1526_v56 = vsub.f32 %v6464_v31, %v5758_v17  ;;  %v6468_v17 = vld [vmem:[#allocation61_spill] sm:$0xff]  ;;  %v5933_v37 = vpop.eup %4902  ;;  %v1667_v15 = vsel %vm581_vm1, %v5929_v50, 0.0  ;;  %v6475_v23 = vld [vmem:[#allocation58_spill] sm:$0xff] }
 0x356   : > { %4908 = vpow2.f32 %v1582_v19  ;;  %4765 = vmatpush3.bf16.msra.mxu0 %v4762_v62  ;;  %v4766_v18 = vpack.c.bf16 %v1739_v10, %v1738_v6  ;;  %v1664_v29 = vsel %vm581_vm1, %v5933_v37, 0.0  ;;  %v6477_v62 = vld [vmem:[#allocation62_spill] sm:$0xff] }
 0x357   : > { %4910 = vpow2.f32 %v1580_v49  ;;  %v1663_v60 = vpop.xlane.xlu1 %1662  ;;  %4457 = vmatmul.mubr.msk.f32.gmra.mrb[92].mxu0 %vm581_vm1, %v6463_v52  ;;  %v1588_v48 = vmul.f32 1.442695, %v1526_v56  ;;  %v6478_v52 = vld [vmem:[#allocation2_spill] sm:$0xff] }
 0x358   : > { %4912 = vrcp.f32 %v1663_v60  ;;  %4477 = vmatmul.mubr.msk.f32.gmra.mrb[52].mxu1 %vm581_vm1, %v6465_v26  ;;  %4459 = vmatprep.mubr.msk.f32.mxu0 %vm581_vm1, %v6466_v63  ;;  %v1660_v54 = vpop.xlane.xlu0 %1659  ;;  %v6479_v26 = vld [vmem:[#allocation3_spill] sm:$0xff] }
 0x359   : > { %4479 = vmatprep.mubr.msk.f32.mxu1 %vm581_vm1, %v6467_v41  ;;  %4768 = vmatprep.subr.msk.bf16.mxu0 %vm5767_vm6, %v4766_v18  ;;  %4914 = vrcp.f32 %v1660_v54  ;;  %v541_v63 = vadd.f32 %v6479_v26, %v5102_v44  ;;  %v6480_v54 = vld [vmem:[#allocation6_spill] sm:$0xff] }
 0x35a   : > { %4916 = vpow2.f32 %v1586_v45  ;;  %4771 = vmatpush3.bf16.msk.msra.mxu0 %vm5767_vm6, %v4766_v18  ;;  %v559_v41 = vadd.f32 %v6480_v54, %v5102_v44 }
 0x35b   : > { %4460 = vmatmul.mubr.msk.f32.gmra.mrb[94].mxu0 %vm581_vm1, %v6468_v17  ;;  %4918 = vpow2.f32 %v1584_v9  ;;  %v535_v9 = vadd.f32 %v6478_v52, %v5102_v44 }
 0x35c   : > { %4480 = vmatmul.mubr.msk.f32.gmra.mrb[54].mxu1 %vm581_vm1, %v6469_v5  ;;  %4920 = vpow2.f32 %v1590_v3 }
 0x35d   : > { %4482 = vmatprep.mubr.msk.f32.mxu1 %vm581_vm1, %v6470_v8  ;;  %4922 = vpow2.f32 %v1588_v48  ;;  %v6481_v48 = vld [vmem:[#allocation4_spill] sm:$0xff]  ;;  %v6482_v8 = vld [vmem:[#allocation7_spill] sm:$0xff] }
 0x35e   : > { %v4905_v30 = vpop.eup %4904  ;;  %v547_v5 = vadd.f32 %v6481_v48, %v5102_v44 }
 0x35f   : > { %v4907_v12 = vpop.eup %4906  ;;  %v1741_v11 = vmul.f32 %v4905_v30, %v5714_v42  ;;  %v565_v30 = vadd.f32 %v6482_v8, %v5102_v44 }
 0x360   : > { %v5940_v28 = vpop.eup %4908  ;;  %4483 = vmatmul.mubr.msk.f32.gmra.mrb[56].mxu1 %vm581_vm1, %v6471_v7  ;;  %1668 = vadd.xlane.f32.xlu1 %v1667_v15  ;;  %v1740_v61 = vmul.f32 %v4907_v12, %v5716_v34 }
 0x361   : > { %v5947_v32 = vpop.eup %4910  ;;  %4485 = vmatprep.mubr.msk.f32.mxu1 %vm581_vm1, %v6472_v35  ;;  %1665 = vadd.xlane.f32.xlu0 %v1664_v29  ;;  %v1673_v58 = vsel %vm581_vm1, %v5940_v28, 0.0  ;;  %v6484_v29 = vld [vmem:[#allocation8_spill] sm:$0xff] }
 0x362   : > { %v4913_v0 = vpop.eup %4912  ;;  %v4772_v42 = vpack.c.bf16 %v1741_v11, %v1740_v61  ;;  %v1670_v4 = vsel %vm581_vm1, %v5947_v32, 0.0  ;;  %v6483_v11 = vld [vmem:[#allocation5_spill] sm:$0xff]  ;;  %v571_v61 = vadd.f32 %v6484_v29, %v5102_v44 }
 0x363   : > { %v4915_v46 = vpop.eup %4914  ;;  %v1743_v25 = vmul.f32 %v4913_v0, %v5722_v27  ;;  %v553_v7 = vadd.f32 %v6483_v11, %v5102_v44 }
 0x364   : > { %v5954_v2 = vpop.eup %4916  ;;  %4486 = vmatmul.mubr.msk.f32.gmra.mrb[58].mxu1 %vm581_vm1, %v6473_v14  ;;  %1674 = vadd.xlane.f32.xlu1 %v1673_v58  ;;  %v1742_v34 = vmul.f32 %v4915_v46, %v5724_v55  ;;  %v6476_v55 = vld [vmem:[#allocation60_spill] sm:$0xff] }
 0x365   : > { %4488 = vmatprep.mubr.msk.f32.mxu1 %vm581_vm1, %v6474_v51  ;;  %4773 = vmatprep.subr.bf16.mxu1 %v4772_v42  ;;  %v5963_v21 = vpop.eup %4918  ;;  %v1679_v53 = vsel %vm581_vm1, %v5954_v2, 0.0 }
 0x366   : > { %1671 = vadd.xlane.f32.xlu0 %v1670_v4  ;;  %4775 = vmatpush3.bf16.msra.mxu1 %v4772_v42  ;;  %v4776_v27 = vpack.c.bf16 %v1743_v25, %v1742_v34  ;;  %v5967_v22 = vpop.eup %4920  ;;  %v1676_v19 = vsel %vm581_vm1, %v5963_v21, 0.0  ;;  %v6485_v42 = vld [vmem:[#allocation9_spill] sm:$0xff] }
 0x367   : > { %v5977_v57 = vpop.eup %4922  ;;  %v1685_v20 = vsel %vm581_vm1, %v5967_v22, 0.0  ;;  %v577_v46 = vadd.f32 %v6485_v42, %v5102_v44 }
 0x368   : > { %4489 = vmatmul.mubr.msk.f32.gmra.mrb[60].mxu1 %vm581_vm1, %v6475_v23  ;;  %1680 = vadd.xlane.f32.xlu1 %v1679_v53  ;;  %v1682_v36 = vsel %vm581_vm1, %v5977_v57, 0.0 }
 0x369   : > { %4491 = vmatprep.mubr.msk.f32.mxu1 %vm581_vm1, %v6476_v55  ;;  %4778 = vmatprep.subr.msk.bf16.mxu1 %vm5767_vm6, %v4776_v27 }
 0x36a   : > { %1677 = vadd.xlane.f32.xlu0 %v1676_v19  ;;  %4781 = vmatpush3.bf16.msk.msra.mxu1 %vm5767_vm6, %v4776_v27 }
 0x36c   : > { %4492 = vmatmul.mubr.msk.f32.gmra.mrb[62].mxu1 %vm581_vm1, %v6477_v62  ;;  %1686 = vadd.xlane.f32.xlu1 %v1685_v20 }
 0x36e   : > { %1683 = vadd.xlane.f32.xlu0 %v1682_v36 }
 0x378   : > { %v2712_v49 = vpop.trf.xlu0 }
 0x379   : > { %4502 = vmatprep.mubr.msk.f32.mxu0 %vm581_vm1, %v2712_v49 }
 0x37c   : > { %v2713_v39 = vpop.trf.xlu0 }
 0x37d   : > { %v2937_v24 = vpop.trf.xlu1  ;;  %4503 = vmatmul.mubr.msk.f32.vlgmr.msra.gmra.mrb[96].mxu0 %vm581_vm1, %v2713_v39 }
 0x37e   : > { %4534 = vmatprep.mubr.msk.f32.mxu1 %vm581_vm1, %v2937_v24 }
 0x380   : > { %v2714_v10 = vpop.trf.xlu0 }
 0x381   : > { %v2938_v47 = vpop.trf.xlu1  ;;  %4505 = vmatprep.mubr.msk.f32.mxu0 %vm581_vm1, %v2714_v10 }
 0x382   : > { %4535 = vmatmul.mubr.msk.f32.vlgmr.msra.gmra.mrb[64].mxu1 %vm581_vm1, %v2938_v47 }
 0x384   : > { %v2715_v13 = vpop.trf.xlu0 }
 0x385   : > { %v2939_v38 = vpop.trf.xlu1  ;;  %4506 = vmatmul.mubr.msk.f32.gmra.mrb[98].mxu0 %vm581_vm1, %v2715_v13 }
 0x386   : > { %4537 = vmatprep.mubr.msk.f32.mxu1 %vm581_vm1, %v2939_v38 }
 0x388   : > { %v2716_v1 = vpop.trf.xlu0 }
 0x389   : > { %v2940_v43 = vpop.trf.xlu1  ;;  %4508 = vmatprep.mubr.msk.f32.mxu0 %vm581_vm1, %v2716_v1 }
 0x38a   : > { %4538 = vmatmul.mubr.msk.f32.gmra.mrb[66].mxu1 %vm581_vm1, %v2940_v43 }
 0x38c   : > { %v2717_v6 = vpop.trf.xlu0 }
 0x38d   : > { %v2941_v33 = vpop.trf.xlu1  ;;  %4509 = vmatmul.mubr.msk.f32.gmra.mrb[100].mxu0 %vm581_vm1, %v2717_v6 }
 0x38e   : > { %4540 = vmatprep.mubr.msk.f32.mxu1 %vm581_vm1, %v2941_v33 }
 0x390   : > { %v2718_v45 = vpop.trf.xlu0 }
 0x391   : > { %v2942_v16 = vpop.trf.xlu1  ;;  %4511 = vmatprep.mubr.msk.f32.mxu0 %vm581_vm1, %v2718_v45 }
 0x392   : > { %4541 = vmatmul.mubr.msk.f32.gmra.mrb[68].mxu1 %vm581_vm1, %v2942_v16 }
 0x394   : > { %v2719_v59 = vpop.trf.xlu0 }
 0x395   : > { %v2943_v18 = vpop.trf.xlu1  ;;  %4512 = vmatmul.mubr.msk.f32.gmra.mrb[102].mxu0 %vm581_vm1, %v2719_v59 }
 0x396   : > { %4543 = vmatprep.mubr.msk.f32.mxu1 %vm581_vm1, %v2943_v18 }
 0x398   : > { %v2720_v60 = vpop.trf.xlu0 }
 0x399   : > { %v2944_v31 = vpop.trf.xlu1  ;;  %4514 = vmatprep.mubr.msk.f32.mxu0 %vm581_vm1, %v2720_v60 }
 0x39a   : > { %4544 = vmatmul.mubr.msk.f32.gmra.mrb[70].mxu1 %vm581_vm1, %v2944_v31 }
 0x39b   : > { %3146 = vxpose.xlu0.b32.start [1/4] (short) %v535_v9, 128 }
 0x39c   : > { %v2721_v56 = vpop.trf.xlu0 }
 0x39d   : > { %v2945_v3 = vpop.trf.xlu1  ;;  %4515 = vmatmul.mubr.msk.f32.gmra.mrb[104].mxu0 %vm581_vm1, %v2721_v56 }
 0x39e   : > { %4546 = vmatprep.mubr.msk.f32.mxu1 %vm581_vm1, %v2945_v3 }
 0x39f   : > { %3147 = vxpose.xlu0.b32.cont [2/4] (short) %v541_v63, 128  ;;  %3371 = vxpose.xlu1.b32.start [1/4] (short) %v559_v41, 128 }
 0x3a0   : > { %v2722_v17 = vpop.trf.xlu0 }
 0x3a1   : > { %v2946_v12 = vpop.trf.xlu1  ;;  %4517 = vmatprep.mubr.msk.f32.mxu0 %vm581_vm1, %v2722_v17 }
 0x3a2   : > { %4547 = vmatmul.mubr.msk.f32.gmra.mrb[72].mxu1 %vm581_vm1, %v2946_v12 }
 0x3a3   : > { %3148 = vxpose.xlu0.b32.cont [3/4] (short) %v547_v5, 128  ;;  %3372 = vxpose.xlu1.b32.cont [2/4] (short) %v565_v30, 128 }
 0x3a4   : > { %v2723_v15 = vpop.trf.xlu0 }
 0x3a5   : > { %v2947_v35 = vpop.trf.xlu1  ;;  %4518 = vmatmul.mubr.msk.f32.gmra.mrb[106].mxu0 %vm581_vm1, %v2723_v15 }
 0x3a6   : > { %4549 = vmatprep.mubr.msk.f32.mxu1 %vm581_vm1, %v2947_v35 }
 0x3a7   : > { %3149 = vxpose.xlu0.b32.end [4/4] (short) %v553_v7, 128  ;;  %3373 = vxpose.xlu1.b32.cont [3/4] (short) %v571_v61, 128 }
 0x3a8   : > { %v2724_v0 = vpop.trf.xlu0 }
 0x3a9   : > { %v2948_v58 = vpop.trf.xlu1  ;;  %4520 = vmatprep.mubr.msk.f32.mxu0 %vm581_vm1, %v2724_v0 }
 0x3aa   : > { %4550 = vmatmul.mubr.msk.f32.gmra.mrb[74].mxu1 %vm581_vm1, %v2948_v58 }
 0x3ab   : > { %3374 = vxpose.xlu1.b32.end [4/4] (short) %v577_v46, 128 }
 0x3ac   : > { %v2725_v25 = vpop.trf.xlu0 }
 0x3ad   : > { %v2949_v14 = vpop.trf.xlu1  ;;  %4521 = vmatmul.mubr.msk.f32.gmra.mrb[108].mxu0 %vm581_vm1, %v2725_v25 }
 0x3ae   : > { %4552 = vmatprep.mubr.msk.f32.mxu1 %vm581_vm1, %v2949_v14 }
 0x3b0   : > { %v2726_v34 = vpop.trf.xlu0 }
 0x3b1   : > { %v2950_v51 = vpop.trf.xlu1  ;;  %4523 = vmatprep.mubr.msk.f32.mxu0 %vm581_vm1, %v2726_v34 }
 0x3b2   : > { %4553 = vmatmul.mubr.msk.f32.gmra.mrb[76].mxu1 %vm581_vm1, %v2950_v51 }
 0x3b4   : > { %v2727_v44 = vpop.trf.xlu0 }
 0x3b5   : > { %v2951_v4 = vpop.trf.xlu1  ;;  %4524 = vmatmul.mubr.msk.f32.gmra.mrb[110].mxu0 %vm581_vm1, %v2727_v44 }
 0x3b6   : > { %4555 = vmatprep.mubr.msk.f32.mxu1 %vm581_vm1, %v2951_v4 }
 0x3b9   : > { %v2952_v27 = vpop.trf.xlu1 }
 0x3ba   : > { %4556 = vmatmul.mubr.msk.f32.gmra.mrb[78].mxu1 %vm581_vm1, %v2952_v27 }
 0x3ed   : > { %v1669_v53 = vpop.xlane.xlu1 %1668 }
 0x3ee   : > { %4924 = vrcp.f32 %v1669_v53  ;;  %v1666_v23 = vpop.xlane.xlu0 %1665 }
 0x3ef   : > { %4926 = vrcp.f32 %v1666_v23 }
 0x3f1   : > { %v1675_v55 = vpop.xlane.xlu1 %1674 }
 0x3f2   : > { %4928 = vrcp.f32 %v1675_v55  ;;  %v4376_v19 = vpop.f32.mrb[64].mxu0 }
 0x3f3   : > { %3598 = vst.msk [vmem:[%s6039_s5 + $0x8] sm:$0xff] %vm3596_vm7, %v4376_v19  ;;  %v1672_v20 = vpop.xlane.xlu0 %1671  ;;  %v1942_v62 = vpop.f32.mrb[65].mxu0 }
 0x3f4   : > { %4930 = vrcp.f32 %v1672_v20  ;;  %3597 = vst.msk [vmem:[%s6039_s5] sm:$0xff] %vm3596_vm7, %v1942_v62 }
 0x3f5   : > { %v1681_v36 = vpop.xlane.xlu1 %1680 }
 0x3f6   : > { %4932 = vrcp.f32 %v1681_v36  ;;  %v4379_v49 = vpop.f32.mrb[66].mxu0 }
 0x3f7   : > { %3600 = vst.msk [vmem:[%s6039_s5 + $0x18] sm:$0xff] %vm3596_vm7, %v4379_v49  ;;  %v1678_v39 = vpop.xlane.xlu0 %1677  ;;  %v1952_v24 = vpop.f32.mrb[67].mxu0 }
 0x3f8   : > { %v4925_v10 = vpop.eup %4924  ;;  %4934 = vrcp.f32 %v1678_v39  ;;  %3599 = vst.msk [vmem:[%s6039_s5 + $0x10] sm:$0xff] %vm3596_vm7, %v1952_v24 }
 0x3f9   : > { %v4927_v47 = vpop.eup %4926  ;;  %v1687_v13 = vpop.xlane.xlu1 %1686  ;;  %v1745_v38 = vmul.f32 %v4925_v10, %v5929_v50 }
 0x3fa   : > { %4936 = vrcp.f32 %v1687_v13  ;;  %v4382_v1 = vpop.f32.mrb[68].mxu0  ;;  %v1744_v43 = vmul.f32 %v4927_v47, %v5933_v37 }
 0x3fb   : > { %3602 = vst.msk [vmem:[%s6039_s5 + $0x28] sm:$0xff] %vm3596_vm7, %v4382_v1  ;;  %v1684_v6 = vpop.xlane.xlu0 %1683  ;;  %v1962_v33 = vpop.f32.mrb[69].mxu0 }
 0x3fc   : > { %v4929_v45 = vpop.eup %4928  ;;  %4938 = vrcp.f32 %v1684_v6  ;;  %3601 = vst.msk [vmem:[%s6039_s5 + $0x20] sm:$0xff] %vm3596_vm7, %v1962_v33  ;;  %v4782_v16 = vpack.c.bf16 %v1745_v38, %v1744_v43 }
 0x3fd   : > { %v1747_v59 = vmul.f32 %v4929_v45, %v5940_v28 }
 0x3fe   : > { %v4931_v18 = vpop.eup %4930  ;;  %v4385_v60 = vpop.f32.mrb[70].mxu0  ;;  %4783 = vmatprep.subr.bf16.mxu0 %v4782_v16 }
 0x3ff   : > { %3604 = vst.msk [vmem:[%s6039_s5 + $0x38] sm:$0xff] %vm3596_vm7, %v4385_v60  ;;  %v1972_v50 = vpop.f32.mrb[71].mxu0  ;;  %4785 = vmatpush3.bf16.msra.mxu0 %v4782_v16  ;;  %v1746_v37 = vmul.f32 %v4931_v18, %v5947_v32 }
 0x400   : > { %v4933_v52 = vpop.eup %4932  ;;  %3603 = vst.msk [vmem:[%s6039_s5 + $0x30] sm:$0xff] %vm3596_vm7, %v1972_v50 }
 0x401   : > { %v4786_v9 = vpack.c.bf16 %v1747_v59, %v1746_v37  ;;  %v1749_v31 = vmul.f32 %v4933_v52, %v5954_v2 }
 0x402   : > { %v4935_v56 = vpop.eup %4934  ;;  %v4388_v28 = vpop.f32.mrb[72].mxu0 }
 0x403   : > { %3606 = vst.msk [vmem:[%s6039_s5 + $0x48] sm:$0xff] %vm3596_vm7, %v4388_v28  ;;  %v4408_v26 = vpop.f32.mrb[32].mxu1  ;;  %4788 = vmatprep.subr.msk.bf16.mxu0 %vm5767_vm6, %v4786_v9  ;;  %v1982_v63 = vpop.f32.mrb[73].mxu0  ;;  %v1748_v54 = vmul.f32 %v4935_v56, %v5963_v21 }
 0x404   : > { %v4937_v32 = vpop.eup %4936  ;;  %3614 = vst.msk [vmem:[%s6039_s5 + $0x88] sm:$0xff] %vm3596_vm7, %v4408_v26  ;;  %3605 = vst.msk [vmem:[%s6039_s5 + $0x40] sm:$0xff] %vm3596_vm7, %v1982_v63  ;;  %v2167_v2 = vpop.f32.mrb[33].mxu1  ;;  %4791 = vmatpush3.bf16.msk.msra.mxu0 %vm5767_vm6, %v4786_v9 }
 0x405   : > { %3613 = vst.msk [vmem:[%s6039_s5 + $0x80] sm:$0xff] %vm3596_vm7, %v2167_v2  ;;  %v4792_v41 = vpack.c.bf16 %v1749_v31, %v1748_v54  ;;  %v1751_v3 = vmul.f32 %v4937_v32, %v5967_v22 }
 0x406   : > { %v4939_v17 = vpop.eup %4938  ;;  %v4391_v21 = vpop.f32.mrb[74].mxu0 }
 0x407   : > { %3608 = vst.msk [vmem:[%s6039_s5 + $0x58] sm:$0xff] %vm3596_vm7, %v4391_v21  ;;  %v4411_v48 = vpop.f32.mrb[34].mxu1  ;;  %4793 = vmatprep.subr.bf16.mxu1 %v4792_v41  ;;  %v1992_v5 = vpop.f32.mrb[75].mxu0  ;;  %v1750_v8 = vmul.f32 %v4939_v17, %v5977_v57 }
 0x408   : > { %3616 = vst.msk [vmem:[%s6039_s5 + $0x98] sm:$0xff] %vm3596_vm7, %v4411_v48  ;;  %3607 = vst.msk [vmem:[%s6039_s5 + $0x50] sm:$0xff] %vm3596_vm7, %v1992_v5  ;;  %v2177_v30 = vpop.f32.mrb[35].mxu1  ;;  %4795 = vmatpush3.bf16.msra.mxu1 %v4792_v41 }
 0x409   : > { %3615 = vst.msk [vmem:[%s6039_s5 + $0x90] sm:$0xff] %vm3596_vm7, %v2177_v30  ;;  %v4796_v22 = vpack.c.bf16 %v1751_v3, %v1750_v8 }
 0x40a   : > { %v4394_v12 = vpop.f32.mrb[76].mxu0 }
 0x40b   : > { %3610 = vst.msk [vmem:[%s6039_s5 + $0x68] sm:$0xff] %vm3596_vm7, %v4394_v12  ;;  %v4414_v15 = vpop.f32.mrb[36].mxu1  ;;  %4798 = vmatprep.subr.msk.bf16.mxu1 %vm5767_vm6, %v4796_v22  ;;  %v2002_v57 = vpop.f32.mrb[77].mxu0 }
 0x40c   : > { %3618 = vst.msk [vmem:[%s6039_s5 + $0xa8] sm:$0xff] %vm3596_vm7, %v4414_v15  ;;  %3609 = vst.msk [vmem:[%s6039_s5 + $0x60] sm:$0xff] %vm3596_vm7, %v2002_v57  ;;  %v2187_v11 = vpop.f32.mrb[37].mxu1  ;;  %4801 = vmatpush3.bf16.msk.msra.mxu1 %vm5767_vm6, %v4796_v22 }
 0x40d   : > { %3617 = vst.msk [vmem:[%s6039_s5 + $0xa0] sm:$0xff] %vm3596_vm7, %v2187_v11 }
 0x40e   : > { %v4397_v7 = vpop.f32.mrb[78].mxu0 }
 0x40f   : > { %3612 = vst.msk [vmem:[%s6039_s5 + $0x78] sm:$0xff] %vm3596_vm7, %v4397_v7  ;;  %v4417_v29 = vpop.f32.mrb[38].mxu1  ;;  %v2012_v61 = vpop.f32.mrb[79].mxu0 }
 0x410   : > { %3620 = vst.msk [vmem:[%s6039_s5 + $0xb8] sm:$0xff] %vm3596_vm7, %v4417_v29  ;;  %3611 = vst.msk [vmem:[%s6039_s5 + $0x70] sm:$0xff] %vm3596_vm7, %v2012_v61  ;;  %v2197_v35 = vpop.f32.mrb[39].mxu1 }
 0x411   : > { %3619 = vst.msk [vmem:[%s6039_s5 + $0xb0] sm:$0xff] %vm3596_vm7, %v2197_v35 }
 0x412   : > { %v4440_v40 = vpop.f32.mrb[80].mxu0 }
 0x413   : > { %v4420_v0 = vpop.f32.mrb[40].mxu1  ;;  %3630 = vst.msk [vmem:[%s6039_s5 + $0x108] sm:$0xff] %vm3596_vm7, %v4440_v40  ;;  %v2392_v42 = vpop.f32.mrb[81].mxu0 }
 0x414   : > { %3622 = vst.msk [vmem:[%s6039_s5 + $0xc8] sm:$0xff] %vm3596_vm7, %v4420_v0  ;;  %v2207_v46 = vpop.f32.mrb[41].mxu1  ;;  %3629 = vst.msk [vmem:[%s6039_s5 + $0x100] sm:$0xff] %vm3596_vm7, %v2392_v42 }
 0x415   : > { %3621 = vst.msk [vmem:[%s6039_s5 + $0xc0] sm:$0xff] %vm3596_vm7, %v2207_v46 }
 0x416   : > { %v4443_v58 = vpop.f32.mrb[82].mxu0 }
 0x417   : > { %v4423_v25 = vpop.f32.mrb[42].mxu1  ;;  %3632 = vst.msk [vmem:[%s6039_s5 + $0x118] sm:$0xff] %vm3596_vm7, %v4443_v58  ;;  %v2402_v14 = vpop.f32.mrb[83].mxu0 }
 0x418   : > { %3624 = vst.msk [vmem:[%s6039_s5 + $0xd8] sm:$0xff] %vm3596_vm7, %v4423_v25  ;;  %v2217_v34 = vpop.f32.mrb[43].mxu1  ;;  %3631 = vst.msk [vmem:[%s6039_s5 + $0x110] sm:$0xff] %vm3596_vm7, %v2402_v14 }
 0x419   : > { %3623 = vst.msk [vmem:[%s6039_s5 + $0xd0] sm:$0xff] %vm3596_vm7, %v2217_v34 }
 0x41a   : > { %v4446_v51 = vpop.f32.mrb[84].mxu0 }
 0x41b   : > { %v4426_v44 = vpop.f32.mrb[44].mxu1  ;;  %3634 = vst.msk [vmem:[%s6039_s5 + $0x128] sm:$0xff] %vm3596_vm7, %v4446_v51  ;;  %v2412_v4 = vpop.f32.mrb[85].mxu0 }
 0x41c   : > { %3626 = vst.msk [vmem:[%s6039_s5 + $0xe8] sm:$0xff] %vm3596_vm7, %v4426_v44  ;;  %v2227_v27 = vpop.f32.mrb[45].mxu1  ;;  %3633 = vst.msk [vmem:[%s6039_s5 + $0x120] sm:$0xff] %vm3596_vm7, %v2412_v4  ;;  %v3162_v53 = vpop.trf.xlu0 }
 0x41d   : > { %3625 = vst.msk [vmem:[%s6039_s5 + $0xe0] sm:$0xff] %vm3596_vm7, %v2227_v27  ;;  %4566 = vmatprep.mubr.msk.f32.mxu0 %vm581_vm1, %v3162_v53 }
 0x41e   : > { %v4449_v23 = vpop.f32.mrb[86].mxu0 }
 0x41f   : > { %v4429_v55 = vpop.f32.mrb[46].mxu1  ;;  %3636 = vst.msk [vmem:[%s6039_s5 + $0x138] sm:$0xff] %vm3596_vm7, %v4449_v23  ;;  %v3387_v19 = vpop.trf.xlu1 }
 0x420   : > { %3628 = vst.msk [vmem:[%s6039_s5 + $0xf8] sm:$0xff] %vm3596_vm7, %v4429_v55  ;;  %v2237_v20 = vpop.f32.mrb[47].mxu1  ;;  %v2422_v62 = vpop.f32.mrb[87].mxu0  ;;  %4598 = vmatprep.mubr.msk.f32.mxu1 %vm581_vm1, %v3387_v19 }
 0x421   : > { %3627 = vst.msk [vmem:[%s6039_s5 + $0xf0] sm:$0xff] %vm3596_vm7, %v2237_v20  ;;  %3635 = vst.msk [vmem:[%s6039_s5 + $0x130] sm:$0xff] %vm3596_vm7, %v2422_v62  ;;  %v3163_v36 = vpop.trf.xlu0 }
 0x422   : > { %v4452_v49 = vpop.f32.mrb[88].mxu0  ;;  %4567 = vmatmul.mubr.msk.f32.vlgmr.msra.gmra.mrb[112].mxu0 %vm581_vm1, %v3163_v36 }
 0x423   : > { %3638 = vst.msk [vmem:[%s6039_s5 + $0x148] sm:$0xff] %vm3596_vm7, %v4452_v49  ;;  %v4472_v39 = vpop.f32.mrb[48].mxu1  ;;  %v3388_v24 = vpop.trf.xlu1 }
 0x424   : > { %3646 = vst.msk [vmem:[%s6039_s5 + $0x188] sm:$0xff] %vm3596_vm7, %v4472_v39  ;;  %v2432_v10 = vpop.f32.mrb[89].mxu0  ;;  %v2617_v47 = vpop.f32.mrb[49].mxu1  ;;  %4599 = vmatmul.mubr.msk.f32.vlgmr.msra.gmra.mrb[80].mxu1 %vm581_vm1, %v3388_v24 }
 0x425   : > { %3637 = vst.msk [vmem:[%s6039_s5 + $0x140] sm:$0xff] %vm3596_vm7, %v2432_v10  ;;  %3645 = vst.msk [vmem:[%s6039_s5 + $0x180] sm:$0xff] %vm3596_vm7, %v2617_v47  ;;  %v3164_v13 = vpop.trf.xlu0 }
 0x426   : > { %v4455_v38 = vpop.f32.mrb[90].mxu0  ;;  %4569 = vmatprep.mubr.msk.f32.mxu0 %vm581_vm1, %v3164_v13 }
 0x427   : > { %3640 = vst.msk [vmem:[%s6039_s5 + $0x158] sm:$0xff] %vm3596_vm7, %v4455_v38  ;;  %v4475_v1 = vpop.f32.mrb[50].mxu1  ;;  %v3389_v43 = vpop.trf.xlu1 }
 0x428   : > { %3648 = vst.msk [vmem:[%s6039_s5 + $0x198] sm:$0xff] %vm3596_vm7, %v4475_v1  ;;  %v2442_v6 = vpop.f32.mrb[91].mxu0  ;;  %v2627_v33 = vpop.f32.mrb[51].mxu1  ;;  %4601 = vmatprep.mubr.msk.f32.mxu1 %vm581_vm1, %v3389_v43 }
 0x429   : > { %3639 = vst.msk [vmem:[%s6039_s5 + $0x150] sm:$0xff] %vm3596_vm7, %v2442_v6  ;;  %3647 = vst.msk [vmem:[%s6039_s5 + $0x190] sm:$0xff] %vm3596_vm7, %v2627_v33  ;;  %v3165_v45 = vpop.trf.xlu0 }
 0x42a   : > { %v4458_v16 = vpop.f32.mrb[92].mxu0  ;;  %4570 = vmatmul.mubr.msk.f32.gmra.mrb[114].mxu0 %vm581_vm1, %v3165_v45 }
 0x42b   : > { %3642 = vst.msk [vmem:[%s6039_s5 + $0x168] sm:$0xff] %vm3596_vm7, %v4458_v16  ;;  %v4478_v59 = vpop.f32.mrb[52].mxu1  ;;  %v3390_v18 = vpop.trf.xlu1 }
 0x42c   : > { %3650 = vst.msk [vmem:[%s6039_s5 + $0x1a8] sm:$0xff] %vm3596_vm7, %v4478_v59  ;;  %v2452_v60 = vpop.f32.mrb[93].mxu0  ;;  %v2637_v50 = vpop.f32.mrb[53].mxu1  ;;  %4602 = vmatmul.mubr.msk.f32.gmra.mrb[82].mxu1 %vm581_vm1, %v3390_v18 }
 0x42d   : > { %3641 = vst.msk [vmem:[%s6039_s5 + $0x160] sm:$0xff] %vm3596_vm7, %v2452_v60  ;;  %3649 = vst.msk [vmem:[%s6039_s5 + $0x1a0] sm:$0xff] %vm3596_vm7, %v2637_v50  ;;  %v3166_v37 = vpop.trf.xlu0 }
 0x42e   : > { %v4461_v52 = vpop.f32.mrb[94].mxu0  ;;  %4572 = vmatprep.mubr.msk.f32.mxu0 %vm581_vm1, %v3166_v37 }
 0x42f   : > { %3644 = vst.msk [vmem:[%s6039_s5 + $0x178] sm:$0xff] %vm3596_vm7, %v4461_v52  ;;  %v4481_v9 = vpop.f32.mrb[54].mxu1  ;;  %v3391_v31 = vpop.trf.xlu1 }
 0x430   : > { %3652 = vst.msk [vmem:[%s6039_s5 + $0x1b8] sm:$0xff] %vm3596_vm7, %v4481_v9  ;;  %v2462_v56 = vpop.f32.mrb[95].mxu0  ;;  %v2647_v28 = vpop.f32.mrb[55].mxu1  ;;  %4604 = vmatprep.mubr.msk.f32.mxu1 %vm581_vm1, %v3391_v31 }
 0x431   : > { %3643 = vst.msk [vmem:[%s6039_s5 + $0x170] sm:$0xff] %vm3596_vm7, %v2462_v56  ;;  %3651 = vst.msk [vmem:[%s6039_s5 + $0x1b0] sm:$0xff] %vm3596_vm7, %v2647_v28  ;;  %v3167_v26 = vpop.trf.xlu0 }
 0x432   : > { %4573 = vmatmul.mubr.msk.f32.gmra.mrb[116].mxu0 %vm581_vm1, %v3167_v26 }
 0x433   : > { %v4484_v63 = vpop.f32.mrb[56].mxu1  ;;  %v3392_v54 = vpop.trf.xlu1 }
 0x434   : > { %3654 = vst.msk [vmem:[%s6039_s5 + $0x1c8] sm:$0xff] %vm3596_vm7, %v4484_v63  ;;  %v2657_v32 = vpop.f32.mrb[57].mxu1  ;;  %4605 = vmatmul.mubr.msk.f32.gmra.mrb[84].mxu1 %vm581_vm1, %v3392_v54 }
 0x435   : > { %3653 = vst.msk [vmem:[%s6039_s5 + $0x1c0] sm:$0xff] %vm3596_vm7, %v2657_v32  ;;  %v3168_v2 = vpop.trf.xlu0 }
 0x436   : > { %4575 = vmatprep.mubr.msk.f32.mxu0 %vm581_vm1, %v3168_v2 }
 0x437   : > { %v4487_v41 = vpop.f32.mrb[58].mxu1  ;;  %v3393_v3 = vpop.trf.xlu1 }
 0x438   : > { %3656 = vst.msk [vmem:[%s6039_s5 + $0x1d8] sm:$0xff] %vm3596_vm7, %v4487_v41  ;;  %v2667_v17 = vpop.f32.mrb[59].mxu1  ;;  %4607 = vmatprep.mubr.msk.f32.mxu1 %vm581_vm1, %v3393_v3 }
 0x439   : > { %3655 = vst.msk [vmem:[%s6039_s5 + $0x1d0] sm:$0xff] %vm3596_vm7, %v2667_v17  ;;  %v3169_v21 = vpop.trf.xlu0 }
 0x43a   : > { %4576 = vmatmul.mubr.msk.f32.gmra.mrb[118].mxu0 %vm581_vm1, %v3169_v21 }
 0x43b   : > { %v4490_v48 = vpop.f32.mrb[60].mxu1  ;;  %v3394_v5 = vpop.trf.xlu1 }
 0x43c   : > { %3658 = vst.msk [vmem:[%s6039_s5 + $0x1e8] sm:$0xff] %vm3596_vm7, %v4490_v48  ;;  %v2677_v8 = vpop.f32.mrb[61].mxu1  ;;  %4608 = vmatmul.mubr.msk.f32.gmra.mrb[86].mxu1 %vm581_vm1, %v3394_v5 }
 0x43d   : > { %3657 = vst.msk [vmem:[%s6039_s5 + $0x1e0] sm:$0xff] %vm3596_vm7, %v2677_v8  ;;  %v3170_v30 = vpop.trf.xlu0 }
 0x43e   : > { %4578 = vmatprep.mubr.msk.f32.mxu0 %vm581_vm1, %v3170_v30 }
 0x43f   : > { %v4493_v22 = vpop.f32.mrb[62].mxu1  ;;  %v3395_v12 = vpop.trf.xlu1 }
 0x440   : > { %3660 = vst.msk [vmem:[%s6039_s5 + $0x1f8] sm:$0xff] %vm3596_vm7, %v4493_v22  ;;  %v2687_v15 = vpop.f32.mrb[63].mxu1  ;;  %4610 = vmatprep.mubr.msk.f32.mxu1 %vm581_vm1, %v3395_v12 }
 0x441   : > { %3659 = vst.msk [vmem:[%s6039_s5 + $0x1f0] sm:$0xff] %vm3596_vm7, %v2687_v15  ;;  %v3171_v57 = vpop.trf.xlu0 }
 0x442   : > { %4579 = vmatmul.mubr.msk.f32.gmra.mrb[120].mxu0 %vm581_vm1, %v3171_v57 }
 0x443   : > { %v3396_v11 = vpop.trf.xlu1 }
 0x444   : > { %4611 = vmatmul.mubr.msk.f32.gmra.mrb[88].mxu1 %vm581_vm1, %v3396_v11 }
 0x445   : > { %v3172_v7 = vpop.trf.xlu0 }
 0x446   : > { %4581 = vmatprep.mubr.msk.f32.mxu0 %vm581_vm1, %v3172_v7 }
 0x447   : > { %v3397_v29 = vpop.trf.xlu1 }
 0x448   : > { %4613 = vmatprep.mubr.msk.f32.mxu1 %vm581_vm1, %v3397_v29 }
 0x449   : > { %v3173_v61 = vpop.trf.xlu0 }
 0x44a   : > { %4582 = vmatmul.mubr.msk.f32.gmra.mrb[122].mxu0 %vm581_vm1, %v3173_v61 }
 0x44b   : > { %v3398_v35 = vpop.trf.xlu1 }
 0x44c   : > { %4614 = vmatmul.mubr.msk.f32.gmra.mrb[90].mxu1 %vm581_vm1, %v3398_v35 }
 0x44d   : > { %v3174_v40 = vpop.trf.xlu0 }
 0x44e   : > { %4584 = vmatprep.mubr.msk.f32.mxu0 %vm581_vm1, %v3174_v40 }
 0x44f   : > { %v3399_v0 = vpop.trf.xlu1 }
 0x450   : > { %4616 = vmatprep.mubr.msk.f32.mxu1 %vm581_vm1, %v3399_v0  ;;  %v4504_v42 = vpop.f32.mrb[96].mxu0 }
 0x451   : > { %v3175_v46 = vpop.trf.xlu0  ;;  %3662 = vst.msk [vmem:[%s6039_s5 + $0x208] sm:$0xff] %vm3596_vm7, %v4504_v42  ;;  %v2842_v58 = vpop.f32.mrb[97].mxu0 }
 0x452   : > { %4585 = vmatmul.mubr.msk.f32.gmra.mrb[124].mxu0 %vm581_vm1, %v3175_v46  ;;  %3661 = vst.msk [vmem:[%s6039_s5 + $0x200] sm:$0xff] %vm3596_vm7, %v2842_v58 }
 0x453   : > { %v3400_v25 = vpop.trf.xlu1 }
 0x454   : > { %4617 = vmatmul.mubr.msk.f32.gmra.mrb[92].mxu1 %vm581_vm1, %v3400_v25 }
 0x455   : > { %v3176_v14 = vpop.trf.xlu0  ;;  %v4536_v34 = vpop.f32.mrb[64].mxu1 }
 0x456   : > { %4587 = vmatprep.mubr.msk.f32.mxu0 %vm581_vm1, %v3176_v14  ;;  %3678 = vst.msk [vmem:[%s6039_s5 + $0x288] sm:$0xff] %vm3596_vm7, %v4536_v34  ;;  %v3067_v51 = vpop.f32.mrb[65].mxu1 }
 0x457   : > { %v3401_v44 = vpop.trf.xlu1  ;;  %3677 = vst.msk [vmem:[%s6039_s5 + $0x280] sm:$0xff] %vm3596_vm7, %v3067_v51 }
 0x458   : > { %4619 = vmatprep.mubr.msk.f32.mxu1 %vm581_vm1, %v3401_v44  ;;  %v4507_v4 = vpop.f32.mrb[98].mxu0 }
 0x459   : > { %v3177_v27 = vpop.trf.xlu0  ;;  %3664 = vst.msk [vmem:[%s6039_s5 + $0x218] sm:$0xff] %vm3596_vm7, %v4507_v4  ;;  %v2852_v53 = vpop.f32.mrb[99].mxu0 }
 0x45a   : > { %4588 = vmatmul.mubr.msk.f32.gmra.mrb[126].mxu0 %vm581_vm1, %v3177_v27  ;;  %3663 = vst.msk [vmem:[%s6039_s5 + $0x210] sm:$0xff] %vm3596_vm7, %v2852_v53 }
 0x45b   : > { %v3402_v23 = vpop.trf.xlu1 }
 0x45c   : > { %4620 = vmatmul.mubr.msk.f32.gmra.mrb[94].mxu1 %vm581_vm1, %v3402_v23 }
 0x45d   : > { %v4539_v55 = vpop.f32.mrb[66].mxu1 }
 0x45e   : > { %3680 = vst.msk [vmem:[%s6039_s5 + $0x298] sm:$0xff] %vm3596_vm7, %v4539_v55  ;;  %v3077_v19 = vpop.f32.mrb[67].mxu1 }
 0x45f   : > { %3679 = vst.msk [vmem:[%s6039_s5 + $0x290] sm:$0xff] %vm3596_vm7, %v3077_v19 }
 0x460   : > { %v4510_v20 = vpop.f32.mrb[100].mxu0 }
 0x461   : > { %3666 = vst.msk [vmem:[%s6039_s5 + $0x228] sm:$0xff] %vm3596_vm7, %v4510_v20  ;;  %v2862_v62 = vpop.f32.mrb[101].mxu0 }
 0x462   : > { %3665 = vst.msk [vmem:[%s6039_s5 + $0x220] sm:$0xff] %vm3596_vm7, %v2862_v62 }
 0x465   : > { %v4542_v36 = vpop.f32.mrb[68].mxu1 }
 0x466   : > { %3682 = vst.msk [vmem:[%s6039_s5 + $0x2a8] sm:$0xff] %vm3596_vm7, %v4542_v36  ;;  %v3087_v49 = vpop.f32.mrb[69].mxu1 }
 0x467   : > { %3681 = vst.msk [vmem:[%s6039_s5 + $0x2a0] sm:$0xff] %vm3596_vm7, %v3087_v49 }
 0x468   : > { %v4513_v39 = vpop.f32.mrb[102].mxu0 }
 0x469   : > { %3668 = vst.msk [vmem:[%s6039_s5 + $0x238] sm:$0xff] %vm3596_vm7, %v4513_v39  ;;  %v2872_v24 = vpop.f32.mrb[103].mxu0 }
 0x46a   : > { %3667 = vst.msk [vmem:[%s6039_s5 + $0x230] sm:$0xff] %vm3596_vm7, %v2872_v24 }
 0x46d   : > { %v4545_v10 = vpop.f32.mrb[70].mxu1 }
 0x46e   : > { %3684 = vst.msk [vmem:[%s6039_s5 + $0x2b8] sm:$0xff] %vm3596_vm7, %v4545_v10  ;;  %v3097_v47 = vpop.f32.mrb[71].mxu1 }
 0x46f   : > { %3683 = vst.msk [vmem:[%s6039_s5 + $0x2b0] sm:$0xff] %vm3596_vm7, %v3097_v47 }
 0x470   : > { %v4516_v13 = vpop.f32.mrb[104].mxu0 }
 0x471   : > { %3670 = vst.msk [vmem:[%s6039_s5 + $0x248] sm:$0xff] %vm3596_vm7, %v4516_v13  ;;  %v2882_v38 = vpop.f32.mrb[105].mxu0 }
 0x472   : > { %3669 = vst.msk [vmem:[%s6039_s5 + $0x240] sm:$0xff] %vm3596_vm7, %v2882_v38 }
 0x475   : > { %v4548_v1 = vpop.f32.mrb[72].mxu1 }
 0x476   : > { %3686 = vst.msk [vmem:[%s6039_s5 + $0x2c8] sm:$0xff] %vm3596_vm7, %v4548_v1  ;;  %v3107_v43 = vpop.f32.mrb[73].mxu1 }
 0x477   : > { %3685 = vst.msk [vmem:[%s6039_s5 + $0x2c0] sm:$0xff] %vm3596_vm7, %v3107_v43 }
 0x478   : > { %v4519_v6 = vpop.f32.mrb[106].mxu0 }
 0x479   : > { %3672 = vst.msk [vmem:[%s6039_s5 + $0x258] sm:$0xff] %vm3596_vm7, %v4519_v6  ;;  %v2892_v33 = vpop.f32.mrb[107].mxu0 }
 0x47a   : > { %3671 = vst.msk [vmem:[%s6039_s5 + $0x250] sm:$0xff] %vm3596_vm7, %v2892_v33 }
 0x47d   : > { %v4551_v45 = vpop.f32.mrb[74].mxu1 }
 0x47e   : > { %3688 = vst.msk [vmem:[%s6039_s5 + $0x2d8] sm:$0xff] %vm3596_vm7, %v4551_v45  ;;  %v3117_v16 = vpop.f32.mrb[75].mxu1 }
 0x47f   : > { %3687 = vst.msk [vmem:[%s6039_s5 + $0x2d0] sm:$0xff] %vm3596_vm7, %v3117_v16 }
 0x480   : > { %v4522_v59 = vpop.f32.mrb[108].mxu0 }
 0x481   : > { %3674 = vst.msk [vmem:[%s6039_s5 + $0x268] sm:$0xff] %vm3596_vm7, %v4522_v59  ;;  %v2902_v18 = vpop.f32.mrb[109].mxu0 }
 0x482   : > { %3673 = vst.msk [vmem:[%s6039_s5 + $0x260] sm:$0xff] %vm3596_vm7, %v2902_v18 }
 0x485   : > { %v4554_v60 = vpop.f32.mrb[76].mxu1 }
 0x486   : > { %3690 = vst.msk [vmem:[%s6039_s5 + $0x2e8] sm:$0xff] %vm3596_vm7, %v4554_v60  ;;  %v3127_v50 = vpop.f32.mrb[77].mxu1 }
 0x487   : > { %3689 = vst.msk [vmem:[%s6039_s5 + $0x2e0] sm:$0xff] %vm3596_vm7, %v3127_v50 }
 0x488   : > { %v4525_v37 = vpop.f32.mrb[110].mxu0 }
 0x489   : > { %3676 = vst.msk [vmem:[%s6039_s5 + $0x278] sm:$0xff] %vm3596_vm7, %v4525_v37  ;;  %v2912_v52 = vpop.f32.mrb[111].mxu0 }
 0x48a   : > { %3675 = vst.msk [vmem:[%s6039_s5 + $0x270] sm:$0xff] %vm3596_vm7, %v2912_v52 }
 0x48d   : > { %v4557_v9 = vpop.f32.mrb[78].mxu1 }
 0x48e   : > { %3692 = vst.msk [vmem:[%s6039_s5 + $0x2f8] sm:$0xff] %vm3596_vm7, %v4557_v9  ;;  %v3137_v31 = vpop.f32.mrb[79].mxu1 }
 0x48f   : > { %3691 = vst.msk [vmem:[%s6039_s5 + $0x2f0] sm:$0xff] %vm3596_vm7, %v3137_v31 }
 0x4f5   : > { %v4568_v56 = vpop.f32.mrb[112].mxu0 }
 0x4f6   : > { %3694 = vst.msk [vmem:[%s6039_s5 + $0x308] sm:$0xff] %vm3596_vm7, %v4568_v56  ;;  %v3292_v28 = vpop.f32.mrb[113].mxu0 }
 0x4f7   : > { %3693 = vst.msk [vmem:[%s6039_s5 + $0x300] sm:$0xff] %vm3596_vm7, %v3292_v28  ;;  %v4600_v26 = vpop.f32.mrb[80].mxu1 }
 0x4f8   : > { %3710 = vst.msk [vmem:[%s6039_s5 + $0x388] sm:$0xff] %vm3596_vm7, %v4600_v26  ;;  %v3517_v63 = vpop.f32.mrb[81].mxu1 }
 0x4f9   : > { %3709 = vst.msk [vmem:[%s6039_s5 + $0x380] sm:$0xff] %vm3596_vm7, %v3517_v63 }
 0x4fd   : > { %v4571_v54 = vpop.f32.mrb[114].mxu0 }
 0x4fe   : > { %3696 = vst.msk [vmem:[%s6039_s5 + $0x318] sm:$0xff] %vm3596_vm7, %v4571_v54  ;;  %v3302_v32 = vpop.f32.mrb[115].mxu0 }
 0x4ff   : > { %3695 = vst.msk [vmem:[%s6039_s5 + $0x310] sm:$0xff] %vm3596_vm7, %v3302_v32  ;;  %v4603_v2 = vpop.f32.mrb[82].mxu1 }
 0x500   : > { %3712 = vst.msk [vmem:[%s6039_s5 + $0x398] sm:$0xff] %vm3596_vm7, %v4603_v2  ;;  %v3527_v41 = vpop.f32.mrb[83].mxu1 }
 0x501   : > { %3711 = vst.msk [vmem:[%s6039_s5 + $0x390] sm:$0xff] %vm3596_vm7, %v3527_v41 }
 0x505   : > { %v4574_v3 = vpop.f32.mrb[116].mxu0 }
 0x506   : > { %3698 = vst.msk [vmem:[%s6039_s5 + $0x328] sm:$0xff] %vm3596_vm7, %v4574_v3  ;;  %v3312_v17 = vpop.f32.mrb[117].mxu0 }
 0x507   : > { %3697 = vst.msk [vmem:[%s6039_s5 + $0x320] sm:$0xff] %vm3596_vm7, %v3312_v17  ;;  %v4606_v21 = vpop.f32.mrb[84].mxu1 }
 0x508   : > { %3714 = vst.msk [vmem:[%s6039_s5 + $0x3a8] sm:$0xff] %vm3596_vm7, %v4606_v21  ;;  %v3537_v48 = vpop.f32.mrb[85].mxu1 }
 0x509   : > { %3713 = vst.msk [vmem:[%s6039_s5 + $0x3a0] sm:$0xff] %vm3596_vm7, %v3537_v48 }
 0x50d   : > { %v4577_v5 = vpop.f32.mrb[118].mxu0 }
 0x50e   : > { %3700 = vst.msk [vmem:[%s6039_s5 + $0x338] sm:$0xff] %vm3596_vm7, %v4577_v5  ;;  %v3322_v8 = vpop.f32.mrb[119].mxu0 }
 0x50f   : > { %3699 = vst.msk [vmem:[%s6039_s5 + $0x330] sm:$0xff] %vm3596_vm7, %v3322_v8  ;;  %v4609_v30 = vpop.f32.mrb[86].mxu1 }
 0x510   : > { %3716 = vst.msk [vmem:[%s6039_s5 + $0x3b8] sm:$0xff] %vm3596_vm7, %v4609_v30  ;;  %v3547_v22 = vpop.f32.mrb[87].mxu1 }
 0x511   : > { %3715 = vst.msk [vmem:[%s6039_s5 + $0x3b0] sm:$0xff] %vm3596_vm7, %v3547_v22 }
 0x515   : > { %v4580_v12 = vpop.f32.mrb[120].mxu0 }
 0x516   : > { %3702 = vst.msk [vmem:[%s6039_s5 + $0x348] sm:$0xff] %vm3596_vm7, %v4580_v12  ;;  %v3332_v15 = vpop.f32.mrb[121].mxu0 }
 0x517   : > { %3701 = vst.msk [vmem:[%s6039_s5 + $0x340] sm:$0xff] %vm3596_vm7, %v3332_v15  ;;  %v4612_v57 = vpop.f32.mrb[88].mxu1 }
 0x518   : > { %3718 = vst.msk [vmem:[%s6039_s5 + $0x3c8] sm:$0xff] %vm3596_vm7, %v4612_v57  ;;  %v3557_v11 = vpop.f32.mrb[89].mxu1 }
 0x519   : > { %3717 = vst.msk [vmem:[%s6039_s5 + $0x3c0] sm:$0xff] %vm3596_vm7, %v3557_v11 }
 0x51d   : > { %v4583_v7 = vpop.f32.mrb[122].mxu0 }
 0x51e   : > { %3704 = vst.msk [vmem:[%s6039_s5 + $0x358] sm:$0xff] %vm3596_vm7, %v4583_v7  ;;  %v3342_v29 = vpop.f32.mrb[123].mxu0 }
 0x51f   : > { %3703 = vst.msk [vmem:[%s6039_s5 + $0x350] sm:$0xff] %vm3596_vm7, %v3342_v29  ;;  %v4615_v61 = vpop.f32.mrb[90].mxu1 }
 0x520   : > { %3720 = vst.msk [vmem:[%s6039_s5 + $0x3d8] sm:$0xff] %vm3596_vm7, %v4615_v61  ;;  %v3567_v35 = vpop.f32.mrb[91].mxu1 }
 0x521   : > { %3719 = vst.msk [vmem:[%s6039_s5 + $0x3d0] sm:$0xff] %vm3596_vm7, %v3567_v35 }
 0x525   : > { %v4586_v40 = vpop.f32.mrb[124].mxu0 }
 0x526   : > { %3706 = vst.msk [vmem:[%s6039_s5 + $0x368] sm:$0xff] %vm3596_vm7, %v4586_v40  ;;  %v3352_v0 = vpop.f32.mrb[125].mxu0 }
 0x527   : > { %3705 = vst.msk [vmem:[%s6039_s5 + $0x360] sm:$0xff] %vm3596_vm7, %v3352_v0  ;;  %v4618_v42 = vpop.f32.mrb[92].mxu1 }
 0x528   : > { %3722 = vst.msk [vmem:[%s6039_s5 + $0x3e8] sm:$0xff] %vm3596_vm7, %v4618_v42  ;;  %v3577_v46 = vpop.f32.mrb[93].mxu1 }
 0x529   : > { %3721 = vst.msk [vmem:[%s6039_s5 + $0x3e0] sm:$0xff] %vm3596_vm7, %v3577_v46 }
 0x52d   : > { %v4589_v58 = vpop.f32.mrb[126].mxu0 }
 0x52e   : > { %3708 = vst.msk [vmem:[%s6039_s5 + $0x378] sm:$0xff] %vm3596_vm7, %v4589_v58  ;;  %v3362_v25 = vpop.f32.mrb[127].mxu0 }
 0x52f   : > { %3707 = vst.msk [vmem:[%s6039_s5 + $0x370] sm:$0xff] %vm3596_vm7, %v3362_v25  ;;  %v4621_v14 = vpop.f32.mrb[94].mxu1 }
 0x530   : > { %3724 = vst.msk [vmem:[%s6039_s5 + $0x3f8] sm:$0xff] %vm3596_vm7, %v4621_v14  ;;  %v3587_v34 = vpop.f32.mrb[95].mxu1 }
 0x531   : > { %3723 = vst.msk [vmem:[%s6039_s5 + $0x3f0] sm:$0xff] %vm3596_vm7, %v3587_v34 }
 0x532 PF: > { %s13_s12 = sadd.s32 1, %s4946_s12  }
 0x533   : > { %p10_p4 = scmp.ge.s32.totalorder %s13_s12, 4  }
 0x535   :  { %12 = sbr.rel (!%p10_p4) target bundleno = 1 (0x1), region = 62 }

</bundles_post_ra>
